<compile_context>
chip_gen: v5e
topology: v5e:2x2
jax: 0.10.0
libtpu: 0.0.40
codegen_flags: <defaults>
</compile_context>

<pallas_src>
import functools

import jax
import jax.numpy as jnp
from jax import lax
from jax.experimental import pallas as pl
from jax.experimental.pallas import tpu as pltpu


NEG_SLOPE = 0.1


def _leaky(x, ns=NEG_SLOPE):
    return jnp.where(x >= 0, x, x * ns)


def _round_up(x, m):
    return ((x + m - 1) // m) * m


# ---------------------------------------------------------------------------
# Trunk kernel: input_conv + 3 residual blocks + bias_conv, fused, channel-major.
# One batch element per grid step; activation (H, Lp) kept resident in VMEM.
# Outputs:
#   hx_ref:   (1, Kc*H, Lp) bf16  unfolded (im2col) final activation - head RHS.
#   bias_ref: (1, Cb, L)          bias_conv output already in NCL layout.
# ---------------------------------------------------------------------------
def _trunk_kernel(c_ref, w_in_ref, b_in_ref, wr_ref, br_ref, wb_ref, bb_ref,
                  hx_ref, bias_ref, unf_in_ref, *, Kc, L_valid):
    Lp = c_ref.shape[-1]
    Ccp = c_ref.shape[1]
    H = b_in_ref.shape[0]
    pad_c = (Kc - 1) // 2

    def shifted_tap(x, col, d):
        # y[:, l] = x[:, l + d] if 0 <= l + d < L_valid else 0
        # (lane shift via XLU roll + boundary mask; implements Conv1d zero pad).
        y = x if d == 0 else pltpu.roll(x, (-d) % Lp, axis=1)
        mask = jnp.logical_and(col >= -d, col < L_valid - d)
        return jnp.where(mask, y, 0.0)

    # ---- input conv (K=5, pad=2) as ONE im2col matmul; bf16 ops, f32 acc ----
    cx = c_ref[0]                                             # (Ccp, Lp) f32
    col_c = lax.broadcasted_iota(jnp.int32, (Ccp, Lp), 1)
    for t in range(5):
        unf_in_ref[t * Ccp:(t + 1) * Ccp, :] = (
            shifted_tap(cx, col_c, t - 2).astype(jnp.bfloat16))
    acc = jnp.dot(w_in_ref[...], unf_in_ref[...],
                  preferred_element_type=jnp.float32)
    h = _leaky(acc + b_in_ref[...])                           # (H, Lp) f32

    col_h = lax.broadcasted_iota(jnp.int32, (H, Lp), 1)

    def unfold(x):
        # channel-major im2col into hx_ref: rows [t*H, (t+1)*H) = tap t (bf16).
        for t in range(Kc):
            hx_ref[0, t * H:(t + 1) * H, :] = (
                shifted_tap(x, col_h, t - pad_c).astype(jnp.bfloat16))

    # ---- 3 residual blocks: (conv + lrelu) x 2, residual add. Dropout(0)=id ----
    for blk in range(3):
        x_cur = h
        for sub in range(2):
            idx = 2 * blk + sub
            unfold(x_cur)
            acc = jnp.dot(wr_ref[idx], hx_ref[0],
                          preferred_element_type=jnp.float32)
            x_cur = _leaky(acc + br_ref[idx])
        h = h + x_cur

    # ---- final unfold feeds both kernel_conv (head) and bias_conv ----
    unfold(h)                                                 # hx_ref = head RHS
    accb = jnp.dot(wb_ref[...], hx_ref[0],
                   preferred_element_type=jnp.float32) + bb_ref[...]
    bias_ref[0, :, :] = accb[:, :L_valid].astype(bias_ref.dtype)


# ---------------------------------------------------------------------------
# Head kernel: kernel_conv as one bf16 matmul per (batch, Cout-tile) grid step.
#   hx_ref: (1, Kc*H, Lp) bf16  (index_map constant in j -> fetched once / batch)
#   w_ref:  (TN, Kc*H)    bf16
#   b_ref:  (TN, 1)       f32
#   o_ref:  (1, TN, L)    out_dtype  (NCL layout: final .view is a pure reshape)
# ---------------------------------------------------------------------------
def _head_kernel(hx_ref, w_ref, b_ref, o_ref, *, L_valid):
    acc = jnp.dot(w_ref[...], hx_ref[0], preferred_element_type=jnp.float32)
    acc = acc + b_ref[...]
    o_ref[0, :, :] = acc[:, :L_valid].astype(o_ref.dtype)


def _pick_cout_tile(ckp, lp, kh, out_bytes):
    # Largest lane/sublane friendly Cout tile whose double-buffered output +
    # weight blocks stay within a conservative VMEM budget (v7x: 64 MiB total).
    budget = 12 * 1024 * 1024
    for tn in (512, 384, 256, 128):
        if ckp % tn == 0 and 2 * tn * (lp * out_bytes + kh * 2) <= budget:
            return tn
    return 128


class KernelPredictorParams:
    """Deterministic synthetic parameters, stored in PyTorch Conv1d layout
    (Cout, Cin, K) / (Cout,)."""

    def __init__(self, key, cond_channels, conv_in_channels, conv_out_channels,
                 conv_layers, conv_kernel_size=3, kpnet_hidden_channels=64,
                 kpnet_conv_size=3):
        self.conv_in_channels = conv_in_channels
        self.conv_out_channels = conv_out_channels
        self.conv_kernel_size = conv_kernel_size
        self.conv_layers = conv_layers
        self.kpnet_hidden_channels = kpnet_hidden_channels
        self.kpnet_conv_size = kpnet_conv_size

        kpnet_kernel_channels = (conv_in_channels * conv_out_channels
                                 * conv_kernel_size * conv_layers)
        kpnet_bias_channels = conv_out_channels * conv_layers

        def make_conv(key, cout, cin, k, scale=0.1):
            kw, kb = jax.random.split(key)
            w = scale * jax.random.normal(kw, (cout, cin, k), jnp.float32)
            b = scale * jax.random.normal(kb, (cout,), jnp.float32)
            return w, b

        keys = jax.random.split(key, 9)
        self.input_conv = make_conv(keys[0], kpnet_hidden_channels,
                                    cond_channels, 5)
        # 6 residual convs: block i uses entries (2i, 2i+1)
        self.residual_convs_flat = [
            make_conv(keys[1 + i], kpnet_hidden_channels,
                      kpnet_hidden_channels, kpnet_conv_size)
            for i in range(6)
        ]
        self.kernel_conv = make_conv(keys[7], kpnet_kernel_channels,
                                     kpnet_hidden_channels, kpnet_conv_size)
        self.bias_conv = make_conv(keys[8], kpnet_bias_channels,
                                   kpnet_hidden_channels, kpnet_conv_size)


def kernel_predictor_forward(params, c_ncl, out_dtype=jnp.bfloat16):
    """c_ncl: (batch, cond_channels, cond_length) -- PyTorch NCL convention.

    out_dtype: dtype of the returned kernels/bias.  bf16 by default (halves the
    dominant HBM write; compute/accumulation is always f32).  Pass jnp.float32
    if the downstream LVC consumer needs full precision.

    Returns:
      kernels: (batch, conv_layers, conv_in, conv_out, conv_kernel_size, cond_length)
      bias:    (batch, conv_layers, conv_out, cond_length)
    """
    batch, cond_ch, L = c_ncl.shape
    H = params.kpnet_hidden_channels
    Kc = params.kpnet_conv_size
    layers = params.conv_layers
    cin = params.conv_in_channels
    cout = params.conv_out_channels
    K = params.conv_kernel_size
    assert Kc % 2 == 1, "kpnet_conv_size must be odd (same-length convs)"
    assert H % 8 == 0, "kpnet_hidden_channels must be a multiple of 8"

    Ck = layers * cin * cout * K
    Cb = layers * cout
    KH = Kc * H

    # lane-dense internal length, sublane-aligned cond channels, 128-padded Ck
    Lp = max(128, _round_up(L, 128))
    Ccp = _round_up(cond_ch, 16)
    Ckp = _round_up(Ck, 128)
    out_bytes = jnp.dtype(out_dtype).itemsize

    # tiny input: pad channels + length with zeros (channel-major already = NCL)
    c_pad = jnp.pad(c_ncl, ((0, 0), (0, Ccp - cond_ch), (0, Lp - L)))

    # ---- derive kernel-friendly weight layouts from canonical (Cout,Cin,K) ----
    w_in, b_in = params.input_conv                              # (H, Ccond, 5)
    w_in_p = jnp.pad(w_in, ((0, 0), (0, Ccp - cond_ch), (0, 0)))
    w_in_k = jnp.transpose(w_in_p, (0, 2, 1)).reshape(H, 5 * Ccp)
    w_in_k = w_in_k.astype(jnp.bfloat16)
    b_in_k = b_in.reshape(H, 1)

    wr = jnp.stack([w for (w, _) in params.residual_convs_flat])  # (6, H, H, Kc)
    br = jnp.stack([b for (_, b) in params.residual_convs_flat])  # (6, H)
    wr_k = jnp.transpose(wr, (0, 1, 3, 2)).reshape(6, H, KH).astype(jnp.bfloat16)
    br_k = br.reshape(6, H, 1)

    wb, bb = params.bias_conv                                   # (Cb, H, Kc)
    wb_k = jnp.transpose(wb, (0, 2, 1)).reshape(Cb, KH).astype(jnp.bfloat16)
    bb_k = bb.reshape(Cb, 1)

    wk, bk = params.kernel_conv                                 # (Ck, H, Kc)
    # Wh[n, t*H + i] = wk[n, i, t]   (matches the hx im2col row layout)
    wk_k = jnp.transpose(wk, (0, 2, 1)).reshape(Ck, KH).astype(jnp.bfloat16)
    bk_k = bk.reshape(Ck, 1)
    if Ckp != Ck:
        wk_k = jnp.pad(wk_k, ((0, Ckp - Ck), (0, 0)))
        bk_k = jnp.pad(bk_k, ((0, Ckp - Ck), (0, 0)))

    # ------------------------------- trunk ---------------------------------
    trunk = functools.partial(_trunk_kernel, Kc=Kc, L_valid=L)
    hx, bias_ncl = pl.pallas_call(
        trunk,
        out_shape=(jax.ShapeDtypeStruct((batch, KH, Lp), jnp.bfloat16),
                   jax.ShapeDtypeStruct((batch, Cb, L), out_dtype)),
        grid_spec=pltpu.PrefetchScalarGridSpec(
            num_scalar_prefetch=0,
            grid=(batch,),
            in_specs=[
                pl.BlockSpec((1, Ccp, Lp), lambda b: (b, 0, 0)),
                pl.BlockSpec((H, 5 * Ccp), lambda b: (0, 0)),
                pl.BlockSpec((H, 1), lambda b: (0, 0)),
                pl.BlockSpec((6, H, KH), lambda b: (0, 0, 0)),
                pl.BlockSpec((6, H, 1), lambda b: (0, 0, 0)),
                pl.BlockSpec((Cb, KH), lambda b: (0, 0)),
                pl.BlockSpec((Cb, 1), lambda b: (0, 0)),
            ],
            out_specs=(
                pl.BlockSpec((1, KH, Lp), lambda b: (b, 0, 0)),
                pl.BlockSpec((1, Cb, L), lambda b: (b, 0, 0)),
            ),
            scratch_shapes=[
                pltpu.VMEM((5 * Ccp, Lp), jnp.bfloat16),   # input-conv im2col
            ]),
        compiler_params=pltpu.CompilerParams(
            dimension_semantics=("parallel",),
            vmem_limit_bytes=64 * 1024 * 1024),
    )(c_pad, w_in_k, b_in_k, wr_k, br_k, wb_k, bb_k)

    # -------------------------------- head ---------------------------------
    TN = _pick_cout_tile(Ckp, Lp, KH, out_bytes)
    nj = Ckp // TN
    cost = pl.CostEstimate(
        flops=2 * batch * Ckp * KH * Lp,
        transcendentals=0,
        bytes_accessed=(Ckp * KH * 2 + batch * KH * Lp * 2
                        + Ckp * 4 + batch * Ckp * L * out_bytes))
    head = functools.partial(_head_kernel, L_valid=L)
    k_ncl = pl.pallas_call(
        head,
        out_shape=jax.ShapeDtypeStruct((batch, Ckp, L), out_dtype),
        grid_spec=pltpu.PrefetchScalarGridSpec(
            num_scalar_prefetch=0,
            grid=(batch, nj),
            in_specs=[
                # NOTE: keep grid order (batch outer, Cout-tile inner) -- hx's
                # index_map is constant in j, so it is DMA'd once per batch and
                # stays VMEM-resident across all Cout tiles.
                pl.BlockSpec((1, KH, Lp), lambda b, j: (b, 0, 0)),
                pl.BlockSpec((TN, KH), lambda b, j: (j, 0)),
                pl.BlockSpec((TN, 1), lambda b, j: (j, 0)),
            ],
            out_specs=pl.BlockSpec((1, TN, L), lambda b, j: (b, j, 0)),
        ),
        compiler_params=pltpu.CompilerParams(
            dimension_semantics=("parallel", "parallel"),
            vmem_limit_bytes=64 * 1024 * 1024),
        cost_estimate=cost,
    )(hx, wk_k, bk_k)

    if Ckp != Ck:
        k_ncl = k_ncl[:, :Ck, :]

    # NCL outputs -> PyTorch .view(...): pure reshapes, no big transpose.
    kernels = k_ncl.reshape(batch, layers, cin, cout, K, L)
    bias = bias_ncl.reshape(batch, layers, cout, L)
    return kernels, bias


# ---------------------------------------------------------------------------
# pure-JAX reference (PyTorch NCL semantics, f32) for correctness checking
# ---------------------------------------------------------------------------
def _conv1d_ref(x, w, b, padding, apply_act, negative_slope=0.1):
    # x: (B, Cin, L); w: (Cout, Cin, K); b: (Cout,)
    B, Cin, L = x.shape
    Cout, _, K = w.shape
    xp = jnp.pad(x, ((0, 0), (0, 0), (padding, padding)))
    L_out = L + 2 * padding - (K - 1)
    acc = jnp.zeros((B, Cout, L_out), jnp.float32)
    for t in range(K):
        acc = acc + jnp.einsum("bcl,oc->bol", xp[:, :, t:t + L_out], w[:, :, t],
                               precision=lax.Precision.HIGHEST)
    acc = acc + b[None, :, None]
    if apply_act:
        acc = jnp.where(acc >= 0, acc, acc * negative_slope)
    return acc


def kernel_predictor_ref(params, c_ncl):
    batch, _, L = c_ncl.shape
    w, b = params.input_conv
    c = _conv1d_ref(c_ncl, w, b, 2, True)
    pad = (params.kpnet_conv_size - 1) // 2
    for i in range(3):
        w1, b1 = params.residual_convs_flat[2 * i]
        w2, b2 = params.residual_convs_flat[2 * i + 1]
        h = _conv1d_ref(c, w1, b1, pad, True)
        h = _conv1d_ref(h, w2, b2, pad, True)
        c = c + h
    wk, bk = params.kernel_conv
    k = _conv1d_ref(c, wk, bk, pad, False)
    wb, bb = params.bias_conv
    bo = _conv1d_ref(c, wb, bb, pad, False)
    kernels = k.reshape(batch, params.conv_layers, params.conv_in_channels,
                        params.conv_out_channels, params.conv_kernel_size, L)
    bias = bo.reshape(batch, params.conv_layers, params.conv_out_channels, L)
    return kernels, bias


if __name__ == "__main__":
    # small, module-consistent shapes
    batch = 2
    cond_channels = 8
    conv_in_channels = 4
    conv_out_channels = 4
    conv_layers = 2
    conv_kernel_size = 3
    kpnet_hidden_channels = 16
    cond_length = 8

    root = jax.random.PRNGKey(0)
    k_params, k_input = jax.random.split(root)

    params = KernelPredictorParams(
        k_params, cond_channels, conv_in_channels, conv_out_channels,
        conv_layers, conv_kernel_size=conv_kernel_size,
        kpnet_hidden_channels=kpnet_hidden_channels, kpnet_conv_size=3)

    c = jax.random.normal(k_input, (batch, cond_channels, cond_length),
                          jnp.float32)

    kernels, bias = kernel_predictor_forward(params, c)
    kernels, bias = jax.block_until_ready((kernels, bias))

    assert kernels.shape == (batch, conv_layers, conv_in_channels,
                             conv_out_channels, conv_kernel_size, cond_length)
    assert bias.shape == (batch, conv_layers, conv_out_channels, cond_length)

    # correctness check against the f32 reference (pipeline is bf16-operand /
    # f32-accumulate with a bf16 output, hence the tolerance)
    k_ref, b_ref = kernel_predictor_ref(params, c)
    assert jnp.allclose(kernels.astype(jnp.float32), k_ref, atol=3e-2, rtol=3e-2)
    assert jnp.allclose(bias.astype(jnp.float32), b_ref, atol=3e-2, rtol=3e-2)

    print("KERNEL_OK")
</pallas_src>

<mosaic_0001>
module attributes {stable_mosaic.version = 11 : i64} {
  func.func @_trunk_kernel(%arg0: i32, %arg1: memref<1x16x128xf32, #tpu.memory_space<vmem>>, %arg2: memref<16x80xbf16, #tpu.memory_space<vmem>>, %arg3: memref<16x1xf32, #tpu.memory_space<vmem>>, %arg4: memref<6x16x48xbf16, #tpu.memory_space<vmem>>, %arg5: memref<6x16x1xf32, #tpu.memory_space<vmem>>, %arg6: memref<8x48xbf16, #tpu.memory_space<vmem>>, %arg7: memref<8x1xf32, #tpu.memory_space<vmem>>, %arg8: memref<1x48x128xbf16, #tpu.memory_space<vmem>>, %arg9: memref<1x8x8xbf16, #tpu.memory_space<vmem>>, %arg10: memref<80x128xbf16, #tpu.memory_space<vmem>>) attributes {dimension_semantics = [#tpu.dimension_semantics<parallel>], iteration_bounds = array<i64: 2>, scalar_prefetch = 0 : i64, scratch_operands = 1 : i64, tpu.core_type = #tpu.core_type<tc>, window_params = [{transform_indices = @transform_0, window_bounds = array<i64: 1, 16, 128>}, {pipeline_mode = #tpu.pipeline_mode<synchronous>, transform_indices = @transform_1, window_bounds = array<i64: 16, 80>}, {pipeline_mode = #tpu.pipeline_mode<synchronous>, transform_indices = @transform_2, window_bounds = array<i64: 16, 1>}, {pipeline_mode = #tpu.pipeline_mode<synchronous>, transform_indices = @transform_3, window_bounds = array<i64: 6, 16, 48>}, {pipeline_mode = #tpu.pipeline_mode<synchronous>, transform_indices = @transform_4, window_bounds = array<i64: 6, 16, 1>}, {pipeline_mode = #tpu.pipeline_mode<synchronous>, transform_indices = @transform_5, window_bounds = array<i64: 8, 48>}, {pipeline_mode = #tpu.pipeline_mode<synchronous>, transform_indices = @transform_6, window_bounds = array<i64: 8, 1>}, {transform_indices = @transform_7, window_bounds = array<i64: 1, 48, 128>}, {transform_indices = @transform_8, window_bounds = array<i64: 1, 8, 8>}]} {
    %c0 = arith.constant 0 : index
    %c0_0 = arith.constant 0 : index
    %c0_1 = arith.constant 0 : index
    %0 = vector.load %arg1[%c0, %c0_0, %c0_1] : memref<1x16x128xf32, #tpu.memory_space<vmem>>, vector<1x16x128xf32>
    %1 = vector.shape_cast %0 : vector<1x16x128xf32> to vector<16x128xf32>
    %2 = tpu.iota {dimensions = array<i32: 1>} : vector<16x128xi32>
    %c2_i32 = arith.constant 2 : i32
    %3 = tpu.dynamic_rotate %1 by %c2_i32 dim 1 : vector<16x128xf32>, i32 -> vector<16x128xf32>
    %c2_i32_2 = arith.constant 2 : i32
    %4 = vector.broadcast %c2_i32_2 : i32 to vector<16x128xi32>
    %5 = arith.cmpi sge, %2, %4 : vector<16x128xi32>
    %c10_i32 = arith.constant 10 : i32
    %6 = vector.broadcast %c10_i32 : i32 to vector<16x128xi32>
    %7 = arith.cmpi slt, %2, %6 : vector<16x128xi32>
    %8 = arith.andi %5, %7 : vector<16x128xi1>
    %cst = arith.constant 0.000000e+00 : f32
    %9 = vector.broadcast %cst : f32 to vector<16x128xf32>
    %10 = arith.select %8, %3, %9 : vector<16x128xi1>, vector<16x128xf32>
    %11 = arith.truncf %10 : vector<16x128xf32> to vector<16x128xbf16>
    %c0_3 = arith.constant 0 : index
    %c0_4 = arith.constant 0 : index
    %12 = vector.load %arg10[%c0_3, %c0_4] : memref<80x128xbf16, #tpu.memory_space<vmem>>, vector<16x128xbf16>
    tpu.vector_store %arg10[%c0_3, %c0_4], %11 {strides = array<i32>} : memref<80x128xbf16, #tpu.memory_space<vmem>>, vector<16x128xbf16>,
    %c1_i32 = arith.constant 1 : i32
    %13 = tpu.dynamic_rotate %1 by %c1_i32 dim 1 : vector<16x128xf32>, i32 -> vector<16x128xf32>
    %c1_i32_5 = arith.constant 1 : i32
    %14 = vector.broadcast %c1_i32_5 : i32 to vector<16x128xi32>
    %15 = arith.cmpi sge, %2, %14 : vector<16x128xi32>
    %c9_i32 = arith.constant 9 : i32
    %16 = vector.broadcast %c9_i32 : i32 to vector<16x128xi32>
    %17 = arith.cmpi slt, %2, %16 : vector<16x128xi32>
    %18 = arith.andi %15, %17 : vector<16x128xi1>
    %cst_6 = arith.constant 0.000000e+00 : f32
    %19 = vector.broadcast %cst_6 : f32 to vector<16x128xf32>
    %20 = arith.select %18, %13, %19 : vector<16x128xi1>, vector<16x128xf32>
    %21 = arith.truncf %20 : vector<16x128xf32> to vector<16x128xbf16>
    %c16 = arith.constant 16 : index
    %c0_7 = arith.constant 0 : index
    %22 = vector.load %arg10[%c16, %c0_7] : memref<80x128xbf16, #tpu.memory_space<vmem>>, vector<16x128xbf16>
    tpu.vector_store %arg10[%c16, %c0_7], %21 {strides = array<i32>} : memref<80x128xbf16, #tpu.memory_space<vmem>>, vector<16x128xbf16>,
    %c0_i32 = arith.constant 0 : i32
    %23 = vector.broadcast %c0_i32 : i32 to vector<16x128xi32>
    %24 = arith.cmpi sge, %2, %23 : vector<16x128xi32>
    %c8_i32 = arith.constant 8 : i32
    %25 = vector.broadcast %c8_i32 : i32 to vector<16x128xi32>
    %26 = arith.cmpi slt, %2, %25 : vector<16x128xi32>
    %27 = arith.andi %24, %26 : vector<16x128xi1>
    %cst_8 = arith.constant 0.000000e+00 : f32
    %28 = vector.broadcast %cst_8 : f32 to vector<16x128xf32>
    %29 = arith.select %27, %1, %28 : vector<16x128xi1>, vector<16x128xf32>
    %30 = arith.truncf %29 : vector<16x128xf32> to vector<16x128xbf16>
    %c32 = arith.constant 32 : index
    %c0_9 = arith.constant 0 : index
    %31 = vector.load %arg10[%c32, %c0_9] : memref<80x128xbf16, #tpu.memory_space<vmem>>, vector<16x128xbf16>
    tpu.vector_store %arg10[%c32, %c0_9], %30 {strides = array<i32>} : memref<80x128xbf16, #tpu.memory_space<vmem>>, vector<16x128xbf16>,
    %c127_i32 = arith.constant 127 : i32
    %32 = tpu.dynamic_rotate %1 by %c127_i32 dim 1 : vector<16x128xf32>, i32 -> vector<16x128xf32>
    %c-1_i32 = arith.constant -1 : i32
    %33 = vector.broadcast %c-1_i32 : i32 to vector<16x128xi32>
    %34 = arith.cmpi sge, %2, %33 : vector<16x128xi32>
    %c7_i32 = arith.constant 7 : i32
    %35 = vector.broadcast %c7_i32 : i32 to vector<16x128xi32>
    %36 = arith.cmpi slt, %2, %35 : vector<16x128xi32>
    %37 = arith.andi %34, %36 : vector<16x128xi1>
    %cst_10 = arith.constant 0.000000e+00 : f32
    %38 = vector.broadcast %cst_10 : f32 to vector<16x128xf32>
    %39 = arith.select %37, %32, %38 : vector<16x128xi1>, vector<16x128xf32>
    %40 = arith.truncf %39 : vector<16x128xf32> to vector<16x128xbf16>
    %c48 = arith.constant 48 : index
    %c0_11 = arith.constant 0 : index
    %41 = vector.load %arg10[%c48, %c0_11] : memref<80x128xbf16, #tpu.memory_space<vmem>>, vector<16x128xbf16>
    tpu.vector_store %arg10[%c48, %c0_11], %40 {strides = array<i32>} : memref<80x128xbf16, #tpu.memory_space<vmem>>, vector<16x128xbf16>,
    %c126_i32 = arith.constant 126 : i32
    %42 = tpu.dynamic_rotate %1 by %c126_i32 dim 1 : vector<16x128xf32>, i32 -> vector<16x128xf32>
    %c-2_i32 = arith.constant -2 : i32
    %43 = vector.broadcast %c-2_i32 : i32 to vector<16x128xi32>
    %44 = arith.cmpi sge, %2, %43 : vector<16x128xi32>
    %c6_i32 = arith.constant 6 : i32
    %45 = vector.broadcast %c6_i32 : i32 to vector<16x128xi32>
    %46 = arith.cmpi slt, %2, %45 : vector<16x128xi32>
    %47 = arith.andi %44, %46 : vector<16x128xi1>
    %cst_12 = arith.constant 0.000000e+00 : f32
    %48 = vector.broadcast %cst_12 : f32 to vector<16x128xf32>
    %49 = arith.select %47, %42, %48 : vector<16x128xi1>, vector<16x128xf32>
    %50 = arith.truncf %49 : vector<16x128xf32> to vector<16x128xbf16>
    %c64 = arith.constant 64 : index
    %c0_13 = arith.constant 0 : index
    %51 = vector.load %arg10[%c64, %c0_13] : memref<80x128xbf16, #tpu.memory_space<vmem>>, vector<16x128xbf16>
    tpu.vector_store %arg10[%c64, %c0_13], %50 {strides = array<i32>} : memref<80x128xbf16, #tpu.memory_space<vmem>>, vector<16x128xbf16>,
    %c0_14 = arith.constant 0 : index
    %c0_15 = arith.constant 0 : index
    %52 = vector.load %arg2[%c0_14, %c0_15] : memref<16x80xbf16, #tpu.memory_space<vmem>>, vector<16x80xbf16>
    %c0_16 = arith.constant 0 : index
    %c0_17 = arith.constant 0 : index
    %53 = vector.load %arg10[%c0_16, %c0_17] : memref<80x128xbf16, #tpu.memory_space<vmem>>, vector<80x128xbf16>
    %cst_18 = arith.constant dense<0.000000e+00> : vector<16x128xf32>
    %54 = tpu.matmul %52, %53, %cst_18 {dimension_numbers = #tpu.dot_dimension_numbers<[1], [0], [0], [1], [0, 0, 1, 1], [], []>} : vector<16x80xbf16>, vector<80x128xbf16>, vector<16x128xf32> -> vector<16x128xf32>
    %c0_19 = arith.constant 0 : index
    %c0_20 = arith.constant 0 : index
    %55 = vector.load %arg3[%c0_19, %c0_20] : memref<16x1xf32, #tpu.memory_space<vmem>>, vector<16x1xf32>
    %56 = vector.broadcast %55 : vector<16x1xf32> to vector<16x128xf32>
    %57 = arith.addf %54, %56 : vector<16x128xf32>
    %cst_21 = arith.constant 0.000000e+00 : f32
    %58 = vector.broadcast %cst_21 : f32 to vector<16x128xf32>
    %59 = arith.cmpf oge, %57, %58 : vector<16x128xf32>
    %cst_22 = arith.constant 1.000000e-01 : f32
    %60 = vector.broadcast %cst_22 : f32 to vector<16x128xf32>
    %61 = arith.mulf %57, %60 : vector<16x128xf32>
    %62 = arith.select %59, %57, %61 : vector<16x128xi1>, vector<16x128xf32>
    %63 = tpu.iota {dimensions = array<i32: 1>} : vector<16x128xi32>
    %c1_i32_23 = arith.constant 1 : i32
    %64 = tpu.dynamic_rotate %62 by %c1_i32_23 dim 1 : vector<16x128xf32>, i32 -> vector<16x128xf32>
    %c1_i32_24 = arith.constant 1 : i32
    %65 = vector.broadcast %c1_i32_24 : i32 to vector<16x128xi32>
    %66 = arith.cmpi sge, %63, %65 : vector<16x128xi32>
    %c9_i32_25 = arith.constant 9 : i32
    %67 = vector.broadcast %c9_i32_25 : i32 to vector<16x128xi32>
    %68 = arith.cmpi slt, %63, %67 : vector<16x128xi32>
    %69 = arith.andi %66, %68 : vector<16x128xi1>
    %cst_26 = arith.constant 0.000000e+00 : f32
    %70 = vector.broadcast %cst_26 : f32 to vector<16x128xf32>
    %71 = arith.select %69, %64, %70 : vector<16x128xi1>, vector<16x128xf32>
    %72 = arith.truncf %71 : vector<16x128xf32> to vector<16x128xbf16>
    %c0_27 = arith.constant 0 : index
    %c0_28 = arith.constant 0 : index
    %c0_29 = arith.constant 0 : index
    %73 = vector.load %arg8[%c0_27, %c0_28, %c0_29] : memref<1x48x128xbf16, #tpu.memory_space<vmem>>, vector<1x16x128xbf16>
    %74 = vector.shape_cast %73 : vector<1x16x128xbf16> to vector<16x128xbf16>
    %75 = vector.shape_cast %72 : vector<16x128xbf16> to vector<1x16x128xbf16>
    tpu.vector_store %arg8[%c0_27, %c0_28, %c0_29], %75 {strides = array<i32>} : memref<1x48x128xbf16, #tpu.memory_space<vmem>>, vector<1x16x128xbf16>,
    %c0_i32_30 = arith.constant 0 : i32
    %76 = vector.broadcast %c0_i32_30 : i32 to vector<16x128xi32>
    %77 = arith.cmpi sge, %63, %76 : vector<16x128xi32>
    %c8_i32_31 = arith.constant 8 : i32
    %78 = vector.broadcast %c8_i32_31 : i32 to vector<16x128xi32>
    %79 = arith.cmpi slt, %63, %78 : vector<16x128xi32>
    %80 = arith.andi %77, %79 : vector<16x128xi1>
    %cst_32 = arith.constant 0.000000e+00 : f32
    %81 = vector.broadcast %cst_32 : f32 to vector<16x128xf32>
    %82 = arith.select %80, %62, %81 : vector<16x128xi1>, vector<16x128xf32>
    %83 = arith.truncf %82 : vector<16x128xf32> to vector<16x128xbf16>
    %c0_33 = arith.constant 0 : index
    %c16_34 = arith.constant 16 : index
    %c0_35 = arith.constant 0 : index
    %84 = vector.load %arg8[%c0_33, %c16_34, %c0_35] : memref<1x48x128xbf16, #tpu.memory_space<vmem>>, vector<1x16x128xbf16>
    %85 = vector.shape_cast %84 : vector<1x16x128xbf16> to vector<16x128xbf16>
    %86 = vector.shape_cast %83 : vector<16x128xbf16> to vector<1x16x128xbf16>
    tpu.vector_store %arg8[%c0_33, %c16_34, %c0_35], %86 {strides = array<i32>} : memref<1x48x128xbf16, #tpu.memory_space<vmem>>, vector<1x16x128xbf16>,
    %c127_i32_36 = arith.constant 127 : i32
    %87 = tpu.dynamic_rotate %62 by %c127_i32_36 dim 1 : vector<16x128xf32>, i32 -> vector<16x128xf32>
    %c-1_i32_37 = arith.constant -1 : i32
    %88 = vector.broadcast %c-1_i32_37 : i32 to vector<16x128xi32>
    %89 = arith.cmpi sge, %63, %88 : vector<16x128xi32>
    %c7_i32_38 = arith.constant 7 : i32
    %90 = vector.broadcast %c7_i32_38 : i32 to vector<16x128xi32>
    %91 = arith.cmpi slt, %63, %90 : vector<16x128xi32>
    %92 = arith.andi %89, %91 : vector<16x128xi1>
    %cst_39 = arith.constant 0.000000e+00 : f32
    %93 = vector.broadcast %cst_39 : f32 to vector<16x128xf32>
    %94 = arith.select %92, %87, %93 : vector<16x128xi1>, vector<16x128xf32>
    %95 = arith.truncf %94 : vector<16x128xf32> to vector<16x128xbf16>
    %c0_40 = arith.constant 0 : index
    %c32_41 = arith.constant 32 : index
    %c0_42 = arith.constant 0 : index
    %96 = vector.load %arg8[%c0_40, %c32_41, %c0_42] : memref<1x48x128xbf16, #tpu.memory_space<vmem>>, vector<1x16x128xbf16>
    %97 = vector.shape_cast %96 : vector<1x16x128xbf16> to vector<16x128xbf16>
    %98 = vector.shape_cast %95 : vector<16x128xbf16> to vector<1x16x128xbf16>
    tpu.vector_store %arg8[%c0_40, %c32_41, %c0_42], %98 {strides = array<i32>} : memref<1x48x128xbf16, #tpu.memory_space<vmem>>, vector<1x16x128xbf16>,
    %c0_43 = arith.constant 0 : index
    %c0_44 = arith.constant 0 : index
    %c0_45 = arith.constant 0 : index
    %99 = vector.load %arg4[%c0_43, %c0_44, %c0_45] : memref<6x16x48xbf16, #tpu.memory_space<vmem>>, vector<1x16x48xbf16>
    %100 = vector.shape_cast %99 : vector<1x16x48xbf16> to vector<16x48xbf16>
    %c0_46 = arith.constant 0 : index
    %c0_47 = arith.constant 0 : index
    %c0_48 = arith.constant 0 : index
    %101 = vector.load %arg8[%c0_46, %c0_47, %c0_48] : memref<1x48x128xbf16, #tpu.memory_space<vmem>>, vector<1x48x128xbf16>
    %102 = vector.shape_cast %101 : vector<1x48x128xbf16> to vector<48x128xbf16>
    %cst_49 = arith.constant dense<0.000000e+00> : vector<16x128xf32>
    %103 = tpu.matmul %100, %102, %cst_49 {dimension_numbers = #tpu.dot_dimension_numbers<[1], [0], [0], [1], [0, 0, 1, 1], [], []>} : vector<16x48xbf16>, vector<48x128xbf16>, vector<16x128xf32> -> vector<16x128xf32>
    %c0_50 = arith.constant 0 : index
    %c0_51 = arith.constant 0 : index
    %c0_52 = arith.constant 0 : index
    %104 = vector.load %arg5[%c0_50, %c0_51, %c0_52] : memref<6x16x1xf32, #tpu.memory_space<vmem>>, vector<1x16x1xf32>
    %105 = vector.shape_cast %104 : vector<1x16x1xf32> to vector<16x1xf32>
    %106 = vector.broadcast %105 : vector<16x1xf32> to vector<16x128xf32>
    %107 = arith.addf %103, %106 : vector<16x128xf32>
    %cst_53 = arith.constant 0.000000e+00 : f32
    %108 = vector.broadcast %cst_53 : f32 to vector<16x128xf32>
    %109 = arith.cmpf oge, %107, %108 : vector<16x128xf32>
    %cst_54 = arith.constant 1.000000e-01 : f32
    %110 = vector.broadcast %cst_54 : f32 to vector<16x128xf32>
    %111 = arith.mulf %107, %110 : vector<16x128xf32>
    %112 = arith.select %109, %107, %111 : vector<16x128xi1>, vector<16x128xf32>
    %c1_i32_55 = arith.constant 1 : i32
    %113 = tpu.dynamic_rotate %112 by %c1_i32_55 dim 1 : vector<16x128xf32>, i32 -> vector<16x128xf32>
    %c1_i32_56 = arith.constant 1 : i32
    %114 = vector.broadcast %c1_i32_56 : i32 to vector<16x128xi32>
    %115 = arith.cmpi sge, %63, %114 : vector<16x128xi32>
    %c9_i32_57 = arith.constant 9 : i32
    %116 = vector.broadcast %c9_i32_57 : i32 to vector<16x128xi32>
    %117 = arith.cmpi slt, %63, %116 : vector<16x128xi32>
    %118 = arith.andi %115, %117 : vector<16x128xi1>
    %cst_58 = arith.constant 0.000000e+00 : f32
    %119 = vector.broadcast %cst_58 : f32 to vector<16x128xf32>
    %120 = arith.select %118, %113, %119 : vector<16x128xi1>, vector<16x128xf32>
    %121 = arith.truncf %120 : vector<16x128xf32> to vector<16x128xbf16>
    %c0_59 = arith.constant 0 : index
    %c0_60 = arith.constant 0 : index
    %c0_61 = arith.constant 0 : index
    %122 = vector.load %arg8[%c0_59, %c0_60, %c0_61] : memref<1x48x128xbf16, #tpu.memory_space<vmem>>, vector<1x16x128xbf16>
    %123 = vector.shape_cast %122 : vector<1x16x128xbf16> to vector<16x128xbf16>
    %124 = vector.shape_cast %121 : vector<16x128xbf16> to vector<1x16x128xbf16>
    tpu.vector_store %arg8[%c0_59, %c0_60, %c0_61], %124 {strides = array<i32>} : memref<1x48x128xbf16, #tpu.memory_space<vmem>>, vector<1x16x128xbf16>,
    %c0_i32_62 = arith.constant 0 : i32
    %125 = vector.broadcast %c0_i32_62 : i32 to vector<16x128xi32>
    %126 = arith.cmpi sge, %63, %125 : vector<16x128xi32>
    %c8_i32_63 = arith.constant 8 : i32
    %127 = vector.broadcast %c8_i32_63 : i32 to vector<16x128xi32>
    %128 = arith.cmpi slt, %63, %127 : vector<16x128xi32>
    %129 = arith.andi %126, %128 : vector<16x128xi1>
    %cst_64 = arith.constant 0.000000e+00 : f32
    %130 = vector.broadcast %cst_64 : f32 to vector<16x128xf32>
    %131 = arith.select %129, %112, %130 : vector<16x128xi1>, vector<16x128xf32>
    %132 = arith.truncf %131 : vector<16x128xf32> to vector<16x128xbf16>
    %c0_65 = arith.constant 0 : index
    %c16_66 = arith.constant 16 : index
    %c0_67 = arith.constant 0 : index
    %133 = vector.load %arg8[%c0_65, %c16_66, %c0_67] : memref<1x48x128xbf16, #tpu.memory_space<vmem>>, vector<1x16x128xbf16>
    %134 = vector.shape_cast %133 : vector<1x16x128xbf16> to vector<16x128xbf16>
    %135 = vector.shape_cast %132 : vector<16x128xbf16> to vector<1x16x128xbf16>
    tpu.vector_store %arg8[%c0_65, %c16_66, %c0_67], %135 {strides = array<i32>} : memref<1x48x128xbf16, #tpu.memory_space<vmem>>, vector<1x16x128xbf16>,
    %c127_i32_68 = arith.constant 127 : i32
    %136 = tpu.dynamic_rotate %112 by %c127_i32_68 dim 1 : vector<16x128xf32>, i32 -> vector<16x128xf32>
    %c-1_i32_69 = arith.constant -1 : i32
    %137 = vector.broadcast %c-1_i32_69 : i32 to vector<16x128xi32>
    %138 = arith.cmpi sge, %63, %137 : vector<16x128xi32>
    %c7_i32_70 = arith.constant 7 : i32
    %139 = vector.broadcast %c7_i32_70 : i32 to vector<16x128xi32>
    %140 = arith.cmpi slt, %63, %139 : vector<16x128xi32>
    %141 = arith.andi %138, %140 : vector<16x128xi1>
    %cst_71 = arith.constant 0.000000e+00 : f32
    %142 = vector.broadcast %cst_71 : f32 to vector<16x128xf32>
    %143 = arith.select %141, %136, %142 : vector<16x128xi1>, vector<16x128xf32>
    %144 = arith.truncf %143 : vector<16x128xf32> to vector<16x128xbf16>
    %c0_72 = arith.constant 0 : index
    %c32_73 = arith.constant 32 : index
    %c0_74 = arith.constant 0 : index
    %145 = vector.load %arg8[%c0_72, %c32_73, %c0_74] : memref<1x48x128xbf16, #tpu.memory_space<vmem>>, vector<1x16x128xbf16>
    %146 = vector.shape_cast %145 : vector<1x16x128xbf16> to vector<16x128xbf16>
    %147 = vector.shape_cast %144 : vector<16x128xbf16> to vector<1x16x128xbf16>
    tpu.vector_store %arg8[%c0_72, %c32_73, %c0_74], %147 {strides = array<i32>} : memref<1x48x128xbf16, #tpu.memory_space<vmem>>, vector<1x16x128xbf16>,
    %c1 = arith.constant 1 : index
    %c0_75 = arith.constant 0 : index
    %c0_76 = arith.constant 0 : index
    %148 = vector.load %arg4[%c1, %c0_75, %c0_76] : memref<6x16x48xbf16, #tpu.memory_space<vmem>>, vector<1x16x48xbf16>
    %149 = vector.shape_cast %148 : vector<1x16x48xbf16> to vector<16x48xbf16>
    %c0_77 = arith.constant 0 : index
    %c0_78 = arith.constant 0 : index
    %c0_79 = arith.constant 0 : index
    %150 = vector.load %arg8[%c0_77, %c0_78, %c0_79] : memref<1x48x128xbf16, #tpu.memory_space<vmem>>, vector<1x48x128xbf16>
    %151 = vector.shape_cast %150 : vector<1x48x128xbf16> to vector<48x128xbf16>
    %cst_80 = arith.constant dense<0.000000e+00> : vector<16x128xf32>
    %152 = tpu.matmul %149, %151, %cst_80 {dimension_numbers = #tpu.dot_dimension_numbers<[1], [0], [0], [1], [0, 0, 1, 1], [], []>} : vector<16x48xbf16>, vector<48x128xbf16>, vector<16x128xf32> -> vector<16x128xf32>
    %c1_81 = arith.constant 1 : index
    %c0_82 = arith.constant 0 : index
    %c0_83 = arith.constant 0 : index
    %153 = vector.load %arg5[%c1_81, %c0_82, %c0_83] : memref<6x16x1xf32, #tpu.memory_space<vmem>>, vector<1x16x1xf32>
    %154 = vector.shape_cast %153 : vector<1x16x1xf32> to vector<16x1xf32>
    %155 = vector.broadcast %154 : vector<16x1xf32> to vector<16x128xf32>
    %156 = arith.addf %152, %155 : vector<16x128xf32>
    %cst_84 = arith.constant 0.000000e+00 : f32
    %157 = vector.broadcast %cst_84 : f32 to vector<16x128xf32>
    %158 = arith.cmpf oge, %156, %157 : vector<16x128xf32>
    %cst_85 = arith.constant 1.000000e-01 : f32
    %159 = vector.broadcast %cst_85 : f32 to vector<16x128xf32>
    %160 = arith.mulf %156, %159 : vector<16x128xf32>
    %161 = arith.select %158, %156, %160 : vector<16x128xi1>, vector<16x128xf32>
    %162 = arith.addf %62, %161 : vector<16x128xf32>
    %c1_i32_86 = arith.constant 1 : i32
    %163 = tpu.dynamic_rotate %162 by %c1_i32_86 dim 1 : vector<16x128xf32>, i32 -> vector<16x128xf32>
    %c1_i32_87 = arith.constant 1 : i32
    %164 = vector.broadcast %c1_i32_87 : i32 to vector<16x128xi32>
    %165 = arith.cmpi sge, %63, %164 : vector<16x128xi32>
    %c9_i32_88 = arith.constant 9 : i32
    %166 = vector.broadcast %c9_i32_88 : i32 to vector<16x128xi32>
    %167 = arith.cmpi slt, %63, %166 : vector<16x128xi32>
    %168 = arith.andi %165, %167 : vector<16x128xi1>
    %cst_89 = arith.constant 0.000000e+00 : f32
    %169 = vector.broadcast %cst_89 : f32 to vector<16x128xf32>
    %170 = arith.select %168, %163, %169 : vector<16x128xi1>, vector<16x128xf32>
    %171 = arith.truncf %170 : vector<16x128xf32> to vector<16x128xbf16>
    %c0_90 = arith.constant 0 : index
    %c0_91 = arith.constant 0 : index
    %c0_92 = arith.constant 0 : index
    %172 = vector.load %arg8[%c0_90, %c0_91, %c0_92] : memref<1x48x128xbf16, #tpu.memory_space<vmem>>, vector<1x16x128xbf16>
    %173 = vector.shape_cast %172 : vector<1x16x128xbf16> to vector<16x128xbf16>
    %174 = vector.shape_cast %171 : vector<16x128xbf16> to vector<1x16x128xbf16>
    tpu.vector_store %arg8[%c0_90, %c0_91, %c0_92], %174 {strides = array<i32>} : memref<1x48x128xbf16, #tpu.memory_space<vmem>>, vector<1x16x128xbf16>,
    %c0_i32_93 = arith.constant 0 : i32
    %175 = vector.broadcast %c0_i32_93 : i32 to vector<16x128xi32>
    %176 = arith.cmpi sge, %63, %175 : vector<16x128xi32>
    %c8_i32_94 = arith.constant 8 : i32
    %177 = vector.broadcast %c8_i32_94 : i32 to vector<16x128xi32>
    %178 = arith.cmpi slt, %63, %177 : vector<16x128xi32>
    %179 = arith.andi %176, %178 : vector<16x128xi1>
    %cst_95 = arith.constant 0.000000e+00 : f32
    %180 = vector.broadcast %cst_95 : f32 to vector<16x128xf32>
    %181 = arith.select %179, %162, %180 : vector<16x128xi1>, vector<16x128xf32>
    %182 = arith.truncf %181 : vector<16x128xf32> to vector<16x128xbf16>
    %c0_96 = arith.constant 0 : index
    %c16_97 = arith.constant 16 : index
    %c0_98 = arith.constant 0 : index
    %183 = vector.load %arg8[%c0_96, %c16_97, %c0_98] : memref<1x48x128xbf16, #tpu.memory_space<vmem>>, vector<1x16x128xbf16>
    %184 = vector.shape_cast %183 : vector<1x16x128xbf16> to vector<16x128xbf16>
    %185 = vector.shape_cast %182 : vector<16x128xbf16> to vector<1x16x128xbf16>
    tpu.vector_store %arg8[%c0_96, %c16_97, %c0_98], %185 {strides = array<i32>} : memref<1x48x128xbf16, #tpu.memory_space<vmem>>, vector<1x16x128xbf16>,
    %c127_i32_99 = arith.constant 127 : i32
    %186 = tpu.dynamic_rotate %162 by %c127_i32_99 dim 1 : vector<16x128xf32>, i32 -> vector<16x128xf32>
    %c-1_i32_100 = arith.constant -1 : i32
    %187 = vector.broadcast %c-1_i32_100 : i32 to vector<16x128xi32>
    %188 = arith.cmpi sge, %63, %187 : vector<16x128xi32>
    %c7_i32_101 = arith.constant 7 : i32
    %189 = vector.broadcast %c7_i32_101 : i32 to vector<16x128xi32>
    %190 = arith.cmpi slt, %63, %189 : vector<16x128xi32>
    %191 = arith.andi %188, %190 : vector<16x128xi1>
    %cst_102 = arith.constant 0.000000e+00 : f32
    %192 = vector.broadcast %cst_102 : f32 to vector<16x128xf32>
    %193 = arith.select %191, %186, %192 : vector<16x128xi1>, vector<16x128xf32>
    %194 = arith.truncf %193 : vector<16x128xf32> to vector<16x128xbf16>
    %c0_103 = arith.constant 0 : index
    %c32_104 = arith.constant 32 : index
    %c0_105 = arith.constant 0 : index
    %195 = vector.load %arg8[%c0_103, %c32_104, %c0_105] : memref<1x48x128xbf16, #tpu.memory_space<vmem>>, vector<1x16x128xbf16>
    %196 = vector.shape_cast %195 : vector<1x16x128xbf16> to vector<16x128xbf16>
    %197 = vector.shape_cast %194 : vector<16x128xbf16> to vector<1x16x128xbf16>
    tpu.vector_store %arg8[%c0_103, %c32_104, %c0_105], %197 {strides = array<i32>} : memref<1x48x128xbf16, #tpu.memory_space<vmem>>, vector<1x16x128xbf16>,
    %c2 = arith.constant 2 : index
    %c0_106 = arith.constant 0 : index
    %c0_107 = arith.constant 0 : index
    %198 = vector.load %arg4[%c2, %c0_106, %c0_107] : memref<6x16x48xbf16, #tpu.memory_space<vmem>>, vector<1x16x48xbf16>
    %199 = vector.shape_cast %198 : vector<1x16x48xbf16> to vector<16x48xbf16>
    %c0_108 = arith.constant 0 : index
    %c0_109 = arith.constant 0 : index
    %c0_110 = arith.constant 0 : index
    %200 = vector.load %arg8[%c0_108, %c0_109, %c0_110] : memref<1x48x128xbf16, #tpu.memory_space<vmem>>, vector<1x48x128xbf16>
    %201 = vector.shape_cast %200 : vector<1x48x128xbf16> to vector<48x128xbf16>
    %cst_111 = arith.constant dense<0.000000e+00> : vector<16x128xf32>
    %202 = tpu.matmul %199, %201, %cst_111 {dimension_numbers = #tpu.dot_dimension_numbers<[1], [0], [0], [1], [0, 0, 1, 1], [], []>} : vector<16x48xbf16>, vector<48x128xbf16>, vector<16x128xf32> -> vector<16x128xf32>
    %c2_112 = arith.constant 2 : index
    %c0_113 = arith.constant 0 : index
    %c0_114 = arith.constant 0 : index
    %203 = vector.load %arg5[%c2_112, %c0_113, %c0_114] : memref<6x16x1xf32, #tpu.memory_space<vmem>>, vector<1x16x1xf32>
    %204 = vector.shape_cast %203 : vector<1x16x1xf32> to vector<16x1xf32>
    %205 = vector.broadcast %204 : vector<16x1xf32> to vector<16x128xf32>
    %206 = arith.addf %202, %205 : vector<16x128xf32>
    %cst_115 = arith.constant 0.000000e+00 : f32
    %207 = vector.broadcast %cst_115 : f32 to vector<16x128xf32>
    %208 = arith.cmpf oge, %206, %207 : vector<16x128xf32>
    %cst_116 = arith.constant 1.000000e-01 : f32
    %209 = vector.broadcast %cst_116 : f32 to vector<16x128xf32>
    %210 = arith.mulf %206, %209 : vector<16x128xf32>
    %211 = arith.select %208, %206, %210 : vector<16x128xi1>, vector<16x128xf32>
    %c1_i32_117 = arith.constant 1 : i32
    %212 = tpu.dynamic_rotate %211 by %c1_i32_117 dim 1 : vector<16x128xf32>, i32 -> vector<16x128xf32>
    %c1_i32_118 = arith.constant 1 : i32
    %213 = vector.broadcast %c1_i32_118 : i32 to vector<16x128xi32>
    %214 = arith.cmpi sge, %63, %213 : vector<16x128xi32>
    %c9_i32_119 = arith.constant 9 : i32
    %215 = vector.broadcast %c9_i32_119 : i32 to vector<16x128xi32>
    %216 = arith.cmpi slt, %63, %215 : vector<16x128xi32>
    %217 = arith.andi %214, %216 : vector<16x128xi1>
    %cst_120 = arith.constant 0.000000e+00 : f32
    %218 = vector.broadcast %cst_120 : f32 to vector<16x128xf32>
    %219 = arith.select %217, %212, %218 : vector<16x128xi1>, vector<16x128xf32>
    %220 = arith.truncf %219 : vector<16x128xf32> to vector<16x128xbf16>
    %c0_121 = arith.constant 0 : index
    %c0_122 = arith.constant 0 : index
    %c0_123 = arith.constant 0 : index
    %221 = vector.load %arg8[%c0_121, %c0_122, %c0_123] : memref<1x48x128xbf16, #tpu.memory_space<vmem>>, vector<1x16x128xbf16>
    %222 = vector.shape_cast %221 : vector<1x16x128xbf16> to vector<16x128xbf16>
    %223 = vector.shape_cast %220 : vector<16x128xbf16> to vector<1x16x128xbf16>
    tpu.vector_store %arg8[%c0_121, %c0_122, %c0_123], %223 {strides = array<i32>} : memref<1x48x128xbf16, #tpu.memory_space<vmem>>, vector<1x16x128xbf16>,
    %c0_i32_124 = arith.constant 0 : i32
    %224 = vector.broadcast %c0_i32_124 : i32 to vector<16x128xi32>
    %225 = arith.cmpi sge, %63, %224 : vector<16x128xi32>
    %c8_i32_125 = arith.constant 8 : i32
    %226 = vector.broadcast %c8_i32_125 : i32 to vector<16x128xi32>
    %227 = arith.cmpi slt, %63, %226 : vector<16x128xi32>
    %228 = arith.andi %225, %227 : vector<16x128xi1>
    %cst_126 = arith.constant 0.000000e+00 : f32
    %229 = vector.broadcast %cst_126 : f32 to vector<16x128xf32>
    %230 = arith.select %228, %211, %229 : vector<16x128xi1>, vector<16x128xf32>
    %231 = arith.truncf %230 : vector<16x128xf32> to vector<16x128xbf16>
    %c0_127 = arith.constant 0 : index
    %c16_128 = arith.constant 16 : index
    %c0_129 = arith.constant 0 : index
    %232 = vector.load %arg8[%c0_127, %c16_128, %c0_129] : memref<1x48x128xbf16, #tpu.memory_space<vmem>>, vector<1x16x128xbf16>
    %233 = vector.shape_cast %232 : vector<1x16x128xbf16> to vector<16x128xbf16>
    %234 = vector.shape_cast %231 : vector<16x128xbf16> to vector<1x16x128xbf16>
    tpu.vector_store %arg8[%c0_127, %c16_128, %c0_129], %234 {strides = array<i32>} : memref<1x48x128xbf16, #tpu.memory_space<vmem>>, vector<1x16x128xbf16>,
    %c127_i32_130 = arith.constant 127 : i32
    %235 = tpu.dynamic_rotate %211 by %c127_i32_130 dim 1 : vector<16x128xf32>, i32 -> vector<16x128xf32>
    %c-1_i32_131 = arith.constant -1 : i32
    %236 = vector.broadcast %c-1_i32_131 : i32 to vector<16x128xi32>
    %237 = arith.cmpi sge, %63, %236 : vector<16x128xi32>
    %c7_i32_132 = arith.constant 7 : i32
    %238 = vector.broadcast %c7_i32_132 : i32 to vector<16x128xi32>
    %239 = arith.cmpi slt, %63, %238 : vector<16x128xi32>
    %240 = arith.andi %237, %239 : vector<16x128xi1>
    %cst_133 = arith.constant 0.000000e+00 : f32
    %241 = vector.broadcast %cst_133 : f32 to vector<16x128xf32>
    %242 = arith.select %240, %235, %241 : vector<16x128xi1>, vector<16x128xf32>
    %243 = arith.truncf %242 : vector<16x128xf32> to vector<16x128xbf16>
    %c0_134 = arith.constant 0 : index
    %c32_135 = arith.constant 32 : index
    %c0_136 = arith.constant 0 : index
    %244 = vector.load %arg8[%c0_134, %c32_135, %c0_136] : memref<1x48x128xbf16, #tpu.memory_space<vmem>>, vector<1x16x128xbf16>
    %245 = vector.shape_cast %244 : vector<1x16x128xbf16> to vector<16x128xbf16>
    %246 = vector.shape_cast %243 : vector<16x128xbf16> to vector<1x16x128xbf16>
    tpu.vector_store %arg8[%c0_134, %c32_135, %c0_136], %246 {strides = array<i32>} : memref<1x48x128xbf16, #tpu.memory_space<vmem>>, vector<1x16x128xbf16>,
    %c3 = arith.constant 3 : index
    %c0_137 = arith.constant 0 : index
    %c0_138 = arith.constant 0 : index
    %247 = vector.load %arg4[%c3, %c0_137, %c0_138] : memref<6x16x48xbf16, #tpu.memory_space<vmem>>, vector<1x16x48xbf16>
    %248 = vector.shape_cast %247 : vector<1x16x48xbf16> to vector<16x48xbf16>
    %c0_139 = arith.constant 0 : index
    %c0_140 = arith.constant 0 : index
    %c0_141 = arith.constant 0 : index
    %249 = vector.load %arg8[%c0_139, %c0_140, %c0_141] : memref<1x48x128xbf16, #tpu.memory_space<vmem>>, vector<1x48x128xbf16>
    %250 = vector.shape_cast %249 : vector<1x48x128xbf16> to vector<48x128xbf16>
    %cst_142 = arith.constant dense<0.000000e+00> : vector<16x128xf32>
    %251 = tpu.matmul %248, %250, %cst_142 {dimension_numbers = #tpu.dot_dimension_numbers<[1], [0], [0], [1], [0, 0, 1, 1], [], []>} : vector<16x48xbf16>, vector<48x128xbf16>, vector<16x128xf32> -> vector<16x128xf32>
    %c3_143 = arith.constant 3 : index
    %c0_144 = arith.constant 0 : index
    %c0_145 = arith.constant 0 : index
    %252 = vector.load %arg5[%c3_143, %c0_144, %c0_145] : memref<6x16x1xf32, #tpu.memory_space<vmem>>, vector<1x16x1xf32>
    %253 = vector.shape_cast %252 : vector<1x16x1xf32> to vector<16x1xf32>
    %254 = vector.broadcast %253 : vector<16x1xf32> to vector<16x128xf32>
    %255 = arith.addf %251, %254 : vector<16x128xf32>
    %cst_146 = arith.constant 0.000000e+00 : f32
    %256 = vector.broadcast %cst_146 : f32 to vector<16x128xf32>
    %257 = arith.cmpf oge, %255, %256 : vector<16x128xf32>
    %cst_147 = arith.constant 1.000000e-01 : f32
    %258 = vector.broadcast %cst_147 : f32 to vector<16x128xf32>
    %259 = arith.mulf %255, %258 : vector<16x128xf32>
    %260 = arith.select %257, %255, %259 : vector<16x128xi1>, vector<16x128xf32>
    %261 = arith.addf %162, %260 : vector<16x128xf32>
    %c1_i32_148 = arith.constant 1 : i32
    %262 = tpu.dynamic_rotate %261 by %c1_i32_148 dim 1 : vector<16x128xf32>, i32 -> vector<16x128xf32>
    %c1_i32_149 = arith.constant 1 : i32
    %263 = vector.broadcast %c1_i32_149 : i32 to vector<16x128xi32>
    %264 = arith.cmpi sge, %63, %263 : vector<16x128xi32>
    %c9_i32_150 = arith.constant 9 : i32
    %265 = vector.broadcast %c9_i32_150 : i32 to vector<16x128xi32>
    %266 = arith.cmpi slt, %63, %265 : vector<16x128xi32>
    %267 = arith.andi %264, %266 : vector<16x128xi1>
    %cst_151 = arith.constant 0.000000e+00 : f32
    %268 = vector.broadcast %cst_151 : f32 to vector<16x128xf32>
    %269 = arith.select %267, %262, %268 : vector<16x128xi1>, vector<16x128xf32>
    %270 = arith.truncf %269 : vector<16x128xf32> to vector<16x128xbf16>
    %c0_152 = arith.constant 0 : index
    %c0_153 = arith.constant 0 : index
    %c0_154 = arith.constant 0 : index
    %271 = vector.load %arg8[%c0_152, %c0_153, %c0_154] : memref<1x48x128xbf16, #tpu.memory_space<vmem>>, vector<1x16x128xbf16>
    %272 = vector.shape_cast %271 : vector<1x16x128xbf16> to vector<16x128xbf16>
    %273 = vector.shape_cast %270 : vector<16x128xbf16> to vector<1x16x128xbf16>
    tpu.vector_store %arg8[%c0_152, %c0_153, %c0_154], %273 {strides = array<i32>} : memref<1x48x128xbf16, #tpu.memory_space<vmem>>, vector<1x16x128xbf16>,
    %c0_i32_155 = arith.constant 0 : i32
    %274 = vector.broadcast %c0_i32_155 : i32 to vector<16x128xi32>
    %275 = arith.cmpi sge, %63, %274 : vector<16x128xi32>
    %c8_i32_156 = arith.constant 8 : i32
    %276 = vector.broadcast %c8_i32_156 : i32 to vector<16x128xi32>
    %277 = arith.cmpi slt, %63, %276 : vector<16x128xi32>
    %278 = arith.andi %275, %277 : vector<16x128xi1>
    %cst_157 = arith.constant 0.000000e+00 : f32
    %279 = vector.broadcast %cst_157 : f32 to vector<16x128xf32>
    %280 = arith.select %278, %261, %279 : vector<16x128xi1>, vector<16x128xf32>
    %281 = arith.truncf %280 : vector<16x128xf32> to vector<16x128xbf16>
    %c0_158 = arith.constant 0 : index
    %c16_159 = arith.constant 16 : index
    %c0_160 = arith.constant 0 : index
    %282 = vector.load %arg8[%c0_158, %c16_159, %c0_160] : memref<1x48x128xbf16, #tpu.memory_space<vmem>>, vector<1x16x128xbf16>
    %283 = vector.shape_cast %282 : vector<1x16x128xbf16> to vector<16x128xbf16>
    %284 = vector.shape_cast %281 : vector<16x128xbf16> to vector<1x16x128xbf16>
    tpu.vector_store %arg8[%c0_158, %c16_159, %c0_160], %284 {strides = array<i32>} : memref<1x48x128xbf16, #tpu.memory_space<vmem>>, vector<1x16x128xbf16>,
    %c127_i32_161 = arith.constant 127 : i32
    %285 = tpu.dynamic_rotate %261 by %c127_i32_161 dim 1 : vector<16x128xf32>, i32 -> vector<16x128xf32>
    %c-1_i32_162 = arith.constant -1 : i32
    %286 = vector.broadcast %c-1_i32_162 : i32 to vector<16x128xi32>
    %287 = arith.cmpi sge, %63, %286 : vector<16x128xi32>
    %c7_i32_163 = arith.constant 7 : i32
    %288 = vector.broadcast %c7_i32_163 : i32 to vector<16x128xi32>
    %289 = arith.cmpi slt, %63, %288 : vector<16x128xi32>
    %290 = arith.andi %287, %289 : vector<16x128xi1>
    %cst_164 = arith.constant 0.000000e+00 : f32
    %291 = vector.broadcast %cst_164 : f32 to vector<16x128xf32>
    %292 = arith.select %290, %285, %291 : vector<16x128xi1>, vector<16x128xf32>
    %293 = arith.truncf %292 : vector<16x128xf32> to vector<16x128xbf16>
    %c0_165 = arith.constant 0 : index
    %c32_166 = arith.constant 32 : index
    %c0_167 = arith.constant 0 : index
    %294 = vector.load %arg8[%c0_165, %c32_166, %c0_167] : memref<1x48x128xbf16, #tpu.memory_space<vmem>>, vector<1x16x128xbf16>
    %295 = vector.shape_cast %294 : vector<1x16x128xbf16> to vector<16x128xbf16>
    %296 = vector.shape_cast %293 : vector<16x128xbf16> to vector<1x16x128xbf16>
    tpu.vector_store %arg8[%c0_165, %c32_166, %c0_167], %296 {strides = array<i32>} : memref<1x48x128xbf16, #tpu.memory_space<vmem>>, vector<1x16x128xbf16>,
    %c4 = arith.constant 4 : index
    %c0_168 = arith.constant 0 : index
    %c0_169 = arith.constant 0 : index
    %297 = vector.load %arg4[%c4, %c0_168, %c0_169] : memref<6x16x48xbf16, #tpu.memory_space<vmem>>, vector<1x16x48xbf16>
    %298 = vector.shape_cast %297 : vector<1x16x48xbf16> to vector<16x48xbf16>
    %c0_170 = arith.constant 0 : index
    %c0_171 = arith.constant 0 : index
    %c0_172 = arith.constant 0 : index
    %299 = vector.load %arg8[%c0_170, %c0_171, %c0_172] : memref<1x48x128xbf16, #tpu.memory_space<vmem>>, vector<1x48x128xbf16>
    %300 = vector.shape_cast %299 : vector<1x48x128xbf16> to vector<48x128xbf16>
    %cst_173 = arith.constant dense<0.000000e+00> : vector<16x128xf32>
    %301 = tpu.matmul %298, %300, %cst_173 {dimension_numbers = #tpu.dot_dimension_numbers<[1], [0], [0], [1], [0, 0, 1, 1], [], []>} : vector<16x48xbf16>, vector<48x128xbf16>, vector<16x128xf32> -> vector<16x128xf32>
    %c4_174 = arith.constant 4 : index
    %c0_175 = arith.constant 0 : index
    %c0_176 = arith.constant 0 : index
    %302 = vector.load %arg5[%c4_174, %c0_175, %c0_176] : memref<6x16x1xf32, #tpu.memory_space<vmem>>, vector<1x16x1xf32>
    %303 = vector.shape_cast %302 : vector<1x16x1xf32> to vector<16x1xf32>
    %304 = vector.broadcast %303 : vector<16x1xf32> to vector<16x128xf32>
    %305 = arith.addf %301, %304 : vector<16x128xf32>
    %cst_177 = arith.constant 0.000000e+00 : f32
    %306 = vector.broadcast %cst_177 : f32 to vector<16x128xf32>
    %307 = arith.cmpf oge, %305, %306 : vector<16x128xf32>
    %cst_178 = arith.constant 1.000000e-01 : f32
    %308 = vector.broadcast %cst_178 : f32 to vector<16x128xf32>
    %309 = arith.mulf %305, %308 : vector<16x128xf32>
    %310 = arith.select %307, %305, %309 : vector<16x128xi1>, vector<16x128xf32>
    %c1_i32_179 = arith.constant 1 : i32
    %311 = tpu.dynamic_rotate %310 by %c1_i32_179 dim 1 : vector<16x128xf32>, i32 -> vector<16x128xf32>
    %c1_i32_180 = arith.constant 1 : i32
    %312 = vector.broadcast %c1_i32_180 : i32 to vector<16x128xi32>
    %313 = arith.cmpi sge, %63, %312 : vector<16x128xi32>
    %c9_i32_181 = arith.constant 9 : i32
    %314 = vector.broadcast %c9_i32_181 : i32 to vector<16x128xi32>
    %315 = arith.cmpi slt, %63, %314 : vector<16x128xi32>
    %316 = arith.andi %313, %315 : vector<16x128xi1>
    %cst_182 = arith.constant 0.000000e+00 : f32
    %317 = vector.broadcast %cst_182 : f32 to vector<16x128xf32>
    %318 = arith.select %316, %311, %317 : vector<16x128xi1>, vector<16x128xf32>
    %319 = arith.truncf %318 : vector<16x128xf32> to vector<16x128xbf16>
    %c0_183 = arith.constant 0 : index
    %c0_184 = arith.constant 0 : index
    %c0_185 = arith.constant 0 : index
    %320 = vector.load %arg8[%c0_183, %c0_184, %c0_185] : memref<1x48x128xbf16, #tpu.memory_space<vmem>>, vector<1x16x128xbf16>
    %321 = vector.shape_cast %320 : vector<1x16x128xbf16> to vector<16x128xbf16>
    %322 = vector.shape_cast %319 : vector<16x128xbf16> to vector<1x16x128xbf16>
    tpu.vector_store %arg8[%c0_183, %c0_184, %c0_185], %322 {strides = array<i32>} : memref<1x48x128xbf16, #tpu.memory_space<vmem>>, vector<1x16x128xbf16>,
    %c0_i32_186 = arith.constant 0 : i32
    %323 = vector.broadcast %c0_i32_186 : i32 to vector<16x128xi32>
    %324 = arith.cmpi sge, %63, %323 : vector<16x128xi32>
    %c8_i32_187 = arith.constant 8 : i32
    %325 = vector.broadcast %c8_i32_187 : i32 to vector<16x128xi32>
    %326 = arith.cmpi slt, %63, %325 : vector<16x128xi32>
    %327 = arith.andi %324, %326 : vector<16x128xi1>
    %cst_188 = arith.constant 0.000000e+00 : f32
    %328 = vector.broadcast %cst_188 : f32 to vector<16x128xf32>
    %329 = arith.select %327, %310, %328 : vector<16x128xi1>, vector<16x128xf32>
    %330 = arith.truncf %329 : vector<16x128xf32> to vector<16x128xbf16>
    %c0_189 = arith.constant 0 : index
    %c16_190 = arith.constant 16 : index
    %c0_191 = arith.constant 0 : index
    %331 = vector.load %arg8[%c0_189, %c16_190, %c0_191] : memref<1x48x128xbf16, #tpu.memory_space<vmem>>, vector<1x16x128xbf16>
    %332 = vector.shape_cast %331 : vector<1x16x128xbf16> to vector<16x128xbf16>
    %333 = vector.shape_cast %330 : vector<16x128xbf16> to vector<1x16x128xbf16>
    tpu.vector_store %arg8[%c0_189, %c16_190, %c0_191], %333 {strides = array<i32>} : memref<1x48x128xbf16, #tpu.memory_space<vmem>>, vector<1x16x128xbf16>,
    %c127_i32_192 = arith.constant 127 : i32
    %334 = tpu.dynamic_rotate %310 by %c127_i32_192 dim 1 : vector<16x128xf32>, i32 -> vector<16x128xf32>
    %c-1_i32_193 = arith.constant -1 : i32
    %335 = vector.broadcast %c-1_i32_193 : i32 to vector<16x128xi32>
    %336 = arith.cmpi sge, %63, %335 : vector<16x128xi32>
    %c7_i32_194 = arith.constant 7 : i32
    %337 = vector.broadcast %c7_i32_194 : i32 to vector<16x128xi32>
    %338 = arith.cmpi slt, %63, %337 : vector<16x128xi32>
    %339 = arith.andi %336, %338 : vector<16x128xi1>
    %cst_195 = arith.constant 0.000000e+00 : f32
    %340 = vector.broadcast %cst_195 : f32 to vector<16x128xf32>
    %341 = arith.select %339, %334, %340 : vector<16x128xi1>, vector<16x128xf32>
    %342 = arith.truncf %341 : vector<16x128xf32> to vector<16x128xbf16>
    %c0_196 = arith.constant 0 : index
    %c32_197 = arith.constant 32 : index
    %c0_198 = arith.constant 0 : index
    %343 = vector.load %arg8[%c0_196, %c32_197, %c0_198] : memref<1x48x128xbf16, #tpu.memory_space<vmem>>, vector<1x16x128xbf16>
    %344 = vector.shape_cast %343 : vector<1x16x128xbf16> to vector<16x128xbf16>
    %345 = vector.shape_cast %342 : vector<16x128xbf16> to vector<1x16x128xbf16>
    tpu.vector_store %arg8[%c0_196, %c32_197, %c0_198], %345 {strides = array<i32>} : memref<1x48x128xbf16, #tpu.memory_space<vmem>>, vector<1x16x128xbf16>,
    %c5 = arith.constant 5 : index
    %c0_199 = arith.constant 0 : index
    %c0_200 = arith.constant 0 : index
    %346 = vector.load %arg4[%c5, %c0_199, %c0_200] : memref<6x16x48xbf16, #tpu.memory_space<vmem>>, vector<1x16x48xbf16>
    %347 = vector.shape_cast %346 : vector<1x16x48xbf16> to vector<16x48xbf16>
    %c0_201 = arith.constant 0 : index
    %c0_202 = arith.constant 0 : index
    %c0_203 = arith.constant 0 : index
    %348 = vector.load %arg8[%c0_201, %c0_202, %c0_203] : memref<1x48x128xbf16, #tpu.memory_space<vmem>>, vector<1x48x128xbf16>
    %349 = vector.shape_cast %348 : vector<1x48x128xbf16> to vector<48x128xbf16>
    %cst_204 = arith.constant dense<0.000000e+00> : vector<16x128xf32>
    %350 = tpu.matmul %347, %349, %cst_204 {dimension_numbers = #tpu.dot_dimension_numbers<[1], [0], [0], [1], [0, 0, 1, 1], [], []>} : vector<16x48xbf16>, vector<48x128xbf16>, vector<16x128xf32> -> vector<16x128xf32>
    %c5_205 = arith.constant 5 : index
    %c0_206 = arith.constant 0 : index
    %c0_207 = arith.constant 0 : index
    %351 = vector.load %arg5[%c5_205, %c0_206, %c0_207] : memref<6x16x1xf32, #tpu.memory_space<vmem>>, vector<1x16x1xf32>
    %352 = vector.shape_cast %351 : vector<1x16x1xf32> to vector<16x1xf32>
    %353 = vector.broadcast %352 : vector<16x1xf32> to vector<16x128xf32>
    %354 = arith.addf %350, %353 : vector<16x128xf32>
    %cst_208 = arith.constant 0.000000e+00 : f32
    %355 = vector.broadcast %cst_208 : f32 to vector<16x128xf32>
    %356 = arith.cmpf oge, %354, %355 : vector<16x128xf32>
    %cst_209 = arith.constant 1.000000e-01 : f32
    %357 = vector.broadcast %cst_209 : f32 to vector<16x128xf32>
    %358 = arith.mulf %354, %357 : vector<16x128xf32>
    %359 = arith.select %356, %354, %358 : vector<16x128xi1>, vector<16x128xf32>
    %360 = arith.addf %261, %359 : vector<16x128xf32>
    %c1_i32_210 = arith.constant 1 : i32
    %361 = tpu.dynamic_rotate %360 by %c1_i32_210 dim 1 : vector<16x128xf32>, i32 -> vector<16x128xf32>
    %c1_i32_211 = arith.constant 1 : i32
    %362 = vector.broadcast %c1_i32_211 : i32 to vector<16x128xi32>
    %363 = arith.cmpi sge, %63, %362 : vector<16x128xi32>
    %c9_i32_212 = arith.constant 9 : i32
    %364 = vector.broadcast %c9_i32_212 : i32 to vector<16x128xi32>
    %365 = arith.cmpi slt, %63, %364 : vector<16x128xi32>
    %366 = arith.andi %363, %365 : vector<16x128xi1>
    %cst_213 = arith.constant 0.000000e+00 : f32
    %367 = vector.broadcast %cst_213 : f32 to vector<16x128xf32>
    %368 = arith.select %366, %361, %367 : vector<16x128xi1>, vector<16x128xf32>
    %369 = arith.truncf %368 : vector<16x128xf32> to vector<16x128xbf16>
    %c0_214 = arith.constant 0 : index
    %c0_215 = arith.constant 0 : index
    %c0_216 = arith.constant 0 : index
    %370 = vector.load %arg8[%c0_214, %c0_215, %c0_216] : memref<1x48x128xbf16, #tpu.memory_space<vmem>>, vector<1x16x128xbf16>
    %371 = vector.shape_cast %370 : vector<1x16x128xbf16> to vector<16x128xbf16>
    %372 = vector.shape_cast %369 : vector<16x128xbf16> to vector<1x16x128xbf16>
    tpu.vector_store %arg8[%c0_214, %c0_215, %c0_216], %372 {strides = array<i32>} : memref<1x48x128xbf16, #tpu.memory_space<vmem>>, vector<1x16x128xbf16>,
    %c0_i32_217 = arith.constant 0 : i32
    %373 = vector.broadcast %c0_i32_217 : i32 to vector<16x128xi32>
    %374 = arith.cmpi sge, %63, %373 : vector<16x128xi32>
    %c8_i32_218 = arith.constant 8 : i32
    %375 = vector.broadcast %c8_i32_218 : i32 to vector<16x128xi32>
    %376 = arith.cmpi slt, %63, %375 : vector<16x128xi32>
    %377 = arith.andi %374, %376 : vector<16x128xi1>
    %cst_219 = arith.constant 0.000000e+00 : f32
    %378 = vector.broadcast %cst_219 : f32 to vector<16x128xf32>
    %379 = arith.select %377, %360, %378 : vector<16x128xi1>, vector<16x128xf32>
    %380 = arith.truncf %379 : vector<16x128xf32> to vector<16x128xbf16>
    %c0_220 = arith.constant 0 : index
    %c16_221 = arith.constant 16 : index
    %c0_222 = arith.constant 0 : index
    %381 = vector.load %arg8[%c0_220, %c16_221, %c0_222] : memref<1x48x128xbf16, #tpu.memory_space<vmem>>, vector<1x16x128xbf16>
    %382 = vector.shape_cast %381 : vector<1x16x128xbf16> to vector<16x128xbf16>
    %383 = vector.shape_cast %380 : vector<16x128xbf16> to vector<1x16x128xbf16>
    tpu.vector_store %arg8[%c0_220, %c16_221, %c0_222], %383 {strides = array<i32>} : memref<1x48x128xbf16, #tpu.memory_space<vmem>>, vector<1x16x128xbf16>,
    %c127_i32_223 = arith.constant 127 : i32
    %384 = tpu.dynamic_rotate %360 by %c127_i32_223 dim 1 : vector<16x128xf32>, i32 -> vector<16x128xf32>
    %c-1_i32_224 = arith.constant -1 : i32
    %385 = vector.broadcast %c-1_i32_224 : i32 to vector<16x128xi32>
    %386 = arith.cmpi sge, %63, %385 : vector<16x128xi32>
    %c7_i32_225 = arith.constant 7 : i32
    %387 = vector.broadcast %c7_i32_225 : i32 to vector<16x128xi32>
    %388 = arith.cmpi slt, %63, %387 : vector<16x128xi32>
    %389 = arith.andi %386, %388 : vector<16x128xi1>
    %cst_226 = arith.constant 0.000000e+00 : f32
    %390 = vector.broadcast %cst_226 : f32 to vector<16x128xf32>
    %391 = arith.select %389, %384, %390 : vector<16x128xi1>, vector<16x128xf32>
    %392 = arith.truncf %391 : vector<16x128xf32> to vector<16x128xbf16>
    %c0_227 = arith.constant 0 : index
    %c32_228 = arith.constant 32 : index
    %c0_229 = arith.constant 0 : index
    %393 = vector.load %arg8[%c0_227, %c32_228, %c0_229] : memref<1x48x128xbf16, #tpu.memory_space<vmem>>, vector<1x16x128xbf16>
    %394 = vector.shape_cast %393 : vector<1x16x128xbf16> to vector<16x128xbf16>
    %395 = vector.shape_cast %392 : vector<16x128xbf16> to vector<1x16x128xbf16>
    tpu.vector_store %arg8[%c0_227, %c32_228, %c0_229], %395 {strides = array<i32>} : memref<1x48x128xbf16, #tpu.memory_space<vmem>>, vector<1x16x128xbf16>,
    %c0_230 = arith.constant 0 : index
    %c0_231 = arith.constant 0 : index
    %396 = vector.load %arg6[%c0_230, %c0_231] : memref<8x48xbf16, #tpu.memory_space<vmem>>, vector<8x48xbf16>
    %c0_232 = arith.constant 0 : index
    %c0_233 = arith.constant 0 : index
    %c0_234 = arith.constant 0 : index
    %397 = vector.load %arg8[%c0_232, %c0_233, %c0_234] : memref<1x48x128xbf16, #tpu.memory_space<vmem>>, vector<1x48x128xbf16>
    %398 = vector.shape_cast %397 : vector<1x48x128xbf16> to vector<48x128xbf16>
    %cst_235 = arith.constant dense<0.000000e+00> : vector<8x128xf32>
    %399 = tpu.matmul %396, %398, %cst_235 {dimension_numbers = #tpu.dot_dimension_numbers<[1], [0], [0], [1], [0, 0, 1, 1], [], []>} : vector<8x48xbf16>, vector<48x128xbf16>, vector<8x128xf32> -> vector<8x128xf32>
    %c0_236 = arith.constant 0 : index
    %c0_237 = arith.constant 0 : index
    %400 = vector.load %arg7[%c0_236, %c0_237] : memref<8x1xf32, #tpu.memory_space<vmem>>, vector<8x1xf32>
    %401 = vector.broadcast %400 : vector<8x1xf32> to vector<8x128xf32>
    %402 = arith.addf %399, %401 : vector<8x128xf32>
    %403 = vector.extract_strided_slice %402 {offsets = [0, 0], sizes = [8, 8], strides = [1, 1]} : vector<8x128xf32> to vector<8x8xf32>
    %404 = arith.truncf %403 : vector<8x8xf32> to vector<8x8xbf16>
    %c0_238 = arith.constant 0 : index
    %c0_239 = arith.constant 0 : index
    %c0_240 = arith.constant 0 : index
    %405 = vector.load %arg9[%c0_238, %c0_239, %c0_240] : memref<1x8x8xbf16, #tpu.memory_space<vmem>>, vector<1x8x8xbf16>
    %406 = vector.shape_cast %405 : vector<1x8x8xbf16> to vector<8x8xbf16>
    %407 = vector.shape_cast %404 : vector<8x8xbf16> to vector<1x8x8xbf16>
    tpu.vector_store %arg9[%c0_238, %c0_239, %c0_240], %407 {strides = array<i32>} : memref<1x8x8xbf16, #tpu.memory_space<vmem>>, vector<1x8x8xbf16>,
    return
  }
  func.func @transform_0(%arg0: i32) -> (i32, i32, i32) {
    %c0_i32 = arith.constant 0 : i32
    %c0_i32_0 = arith.constant 0 : i32
    %c0_i32_1 = arith.constant 0 : i32
    return %arg0, %c0_i32, %c0_i32_0 : i32, i32, i32
  }
  func.func @transform_1(%arg0: i32) -> (i32, i32) {
    %c0_i32 = arith.constant 0 : i32
    %c0_i32_0 = arith.constant 0 : i32
    %c0_i32_1 = arith.constant 0 : i32
    return %c0_i32, %c0_i32_0 : i32, i32
  }
  func.func @transform_2(%arg0: i32) -> (i32, i32) {
    %c0_i32 = arith.constant 0 : i32
    %c0_i32_0 = arith.constant 0 : i32
    %c0_i32_1 = arith.constant 0 : i32
    return %c0_i32, %c0_i32_0 : i32, i32
  }
  func.func @transform_3(%arg0: i32) -> (i32, i32, i32) {
    %c0_i32 = arith.constant 0 : i32
    %c0_i32_0 = arith.constant 0 : i32
    %c0_i32_1 = arith.constant 0 : i32
    %c0_i32_2 = arith.constant 0 : i32
    return %c0_i32, %c0_i32_0, %c0_i32_1 : i32, i32, i32
  }
  func.func @transform_4(%arg0: i32) -> (i32, i32, i32) {
    %c0_i32 = arith.constant 0 : i32
    %c0_i32_0 = arith.constant 0 : i32
    %c0_i32_1 = arith.constant 0 : i32
    %c0_i32_2 = arith.constant 0 : i32
    return %c0_i32, %c0_i32_0, %c0_i32_1 : i32, i32, i32
  }
  func.func @transform_5(%arg0: i32) -> (i32, i32) {
    %c0_i32 = arith.constant 0 : i32
    %c0_i32_0 = arith.constant 0 : i32
    %c0_i32_1 = arith.constant 0 : i32
    return %c0_i32, %c0_i32_0 : i32, i32
  }
  func.func @transform_6(%arg0: i32) -> (i32, i32) {
    %c0_i32 = arith.constant 0 : i32
    %c0_i32_0 = arith.constant 0 : i32
    %c0_i32_1 = arith.constant 0 : i32
    return %c0_i32, %c0_i32_0 : i32, i32
  }
  func.func @transform_7(%arg0: i32) -> (i32, i32, i32) {
    %c0_i32 = arith.constant 0 : i32
    %c0_i32_0 = arith.constant 0 : i32
    %c0_i32_1 = arith.constant 0 : i32
    return %arg0, %c0_i32, %c0_i32_0 : i32, i32, i32
  }
  func.func @transform_8(%arg0: i32) -> (i32, i32, i32) {
    %c0_i32 = arith.constant 0 : i32
    %c0_i32_0 = arith.constant 0 : i32
    %c0_i32_1 = arith.constant 0 : i32
    return %arg0, %c0_i32, %c0_i32_0 : i32, i32, i32
  }
}

</mosaic_0001>

<bundles_post_ra>
// kernel: tpu_custom_call.1
= control target key start
LH: loop header
LB: loop body
LE: loop exit
PB: predicated region body
PF: predicated region fallthrough
CT: control target
= control target key end

     0   :  { %s2268_s0 = inlined_call_operand.vmem [shape: f32[2,16,128], index: 0, kind: input, shape index: {}]   ;;  %s2269_s1 = inlined_call_operand.vmem [shape: bf16[16,80], index: 1, kind: input, shape index: {}]   ;;  %s2270_s2 = inlined_call_operand.vmem [shape: f32[16,1], index: 2, kind: input, shape index: {}]   ;;  %s2271_s3 = inlined_call_operand.vmem [shape: bf16[6,16,48], index: 3, kind: input, shape index: {}]   ;;  %s2272_s4 = inlined_call_operand.vmem [shape: f32[6,16,1], index: 4, kind: input, shape index: {}]   ;;  %s2273_s5 = inlined_call_operand.vmem [shape: bf16[8,48], index: 5, kind: input, shape index: {}]   ;;  %s2274_s6 = inlined_call_operand.vmem [shape: f32[8,1], index: 6, kind: input, shape index: {}]   ;;  %s2275_s7 = inlined_call_operand.hbm [shape: bf16[2,48,128], index: 7, kind: output, shape index: {0}]   ;;  %s2276_s8 = inlined_call_operand.hbm [shape: bf16[2,8,8], index: 8, kind: output, shape index: {1}]  }
   0x1   :  { %2277 = sst [smem:[#allocation9_spill]] %s2268_s0 }
   0x2   :  { %2278 = sst [smem:[#allocation10_spill]] %s2269_s1 }
   0x3   :  { %2279 = sst [smem:[#allocation11_spill]] %s2270_s2 }
   0x4   :  { %14 = vsyncpa [#allocation4], 0 }
   0x5   :  { %16 = vsyncpa [#allocation4 + $0x1], 0 }
   0x6   :  { %17 = vsyncpa [#allocation6], 0 }
   0x7   :  { %19 = vsyncpa [#allocation6 + $0x1], 0  ;;  %s1887_s27 = smov 0   ;;  %s1889_s28 = smov 0  }
   0x8   :  { %s1891_s29 = smov 0   ;;  %s1893_s30 = smov 0  }
   0x9 LB: > { %s1908_s9 = sadd.s32 4294967295, %s1833_s30   ;;  %s1239_s10 = sadd.s32 4294967294, %s1833_s30   ;;  %s1833_s30 = sphi %s1893_s30, %s2290_s30   ;;  %s1829_s29 = sphi %s1891_s29, %s2289_s29   ;;  %s1825_s28 = sphi %s1889_s28, %s2288_s28   ;;  %s1821_s27 = sphi %s1887_s27, %s2287_s27  }
   0xa   : > { %s1912_s11 = sadd.s32 1, %s1833_s30   ;;  %s184_s12 = sadd.s32 1, %s1829_s29 }
   0xb   : > { %s181_s13 = ssub.s32 %s1833_s30, %s1912_s11  ;;  %p194_p0 = scmp.ne.s32.totalorder %s1829_s29, %s1825_s28 }
   0xc   : > { %p182_p1 = scmp.eq.s32.totalorder %s181_s13, 0  ;;  %p195_p2 = scmp.eq.s32.totalorder %s1908_s9, 1 }
   0xd   : > { %p200_p3 = scmp.ne.s32.totalorder %s1825_s28, %s1821_s27  ;;  %p201_p4 = scmp.eq.s32.totalorder %s1239_s10, 1 }
   0xe   : > { %s1923_s14 = scalar_select %p182_p1, %s1829_s29, %s184_s12  }
   0xf   : > { %p1925_p5 = por %p195_p2, %p194_p0  ;;  %p1929_p6 = por %p201_p4, %p200_p3 }
  0x10   : > { %p1242_p7 = scmp.ge.s32.totalorder %s1833_s30, 1  ;;  %p271_p8 = scmp.lt.s32.totalorder %s1833_s30, 3 }
  0x12   : > { %p272_p9 = pnand %p1242_p7, %p271_p8 }
  0x13   : > { %p310_p10 = scmp.lt.s32.totalorder (!%p272_p9), %s1908_s9, 1  ;;  %s2282_s0 = sld [smem:[#allocation9_spill]] (!%p272_p9) }
  0x14   : > { %275 = sbr.rel (%p272_p9) target bundleno = 2302 (0x8fe), region = 48  ;;  %s1835_s22 = smov (!%p272_p9), 126  }
  0x15   : > { %s1836_s23 = smov (!%p272_p9), 1   ;;  %s1837_s24 = smov (!%p272_p9), 127  }
  0x16   : > { %s1838_s25 = smov (!%p272_p9), 2   ;;  %s2285_s2 = sld [smem:[#allocation11_spill]] (!%p272_p9) }
  0x17   : > { %s2286_s1 = sld [smem:[#allocation10_spill]] (!%p272_p9)  ;;  %s1594_s26 = smul.u32 (!%p272_p9), 24, %s1908_s9 }
  0x19   : > { %v318_v0 = vlaneseq  ;;  %s311_s17 = scalar_select %p310_p10, %s1908_s9, 1  ;;  %v1839_v22 = vmov 0   ;;  %v498_v38 = vld [vmem:[%s2272_s4] sm:$0xff]  ;;  %vm440_vm9 = vcmask 654336   ;;  %v499_v57 = vld [vmem:[%s2272_s4 + $0x8] sm:$0xff]  ;;  %vm533_vm12 = vcmask 392192  }
  0x1a   : > { %1666 = vset.pattern.permute.xlu2 %v1839_v22  ;;  %1677 = vset.pattern.permute.xlu0 %v1839_v22  ;;  %s1126_s13 = scalar_lea.hbm %s2275_s7, %s1594_s26 }
  0x1b   : > { %v1937_v1 = vand.u32 127, %v318_v0  ;;  %s1411_s18 = sshll.u32 %s311_s17, 4  ;;  %1688 = vset.pattern.permute.xlu1 %v1839_v22 }
  0x1c   : > { %s314_s21 = scalar_lea.vmem %s2282_s0, %s1411_s18  ;;  %v393_v21 = vld [vmem:[%s2285_s2] sm:$0xff]  ;;  %v394_v36 = vld [vmem:[%s2285_s2 + $0x8] sm:$0xff]  ;;  %s1129_s18 = sshll.u32 %s1126_s13, 4  ;;  %s1130_s18 = int_to_ptr.hbm [resolvable:$true] %s1129_s18 }
  0x1d   : > { %vm347_vm0 = vcmp.lt.s32.totalorder %v1937_v1, 8  ;;  %v316_v2 = vld [vmem:[%s314_s21] sm:$0xff]  ;;  %v317_v3 = vld [vmem:[%s314_s21 + $0x8] sm:$0xff]  ;;  %vm337_vm1 = vcmp.ge.s32.totalorder %v1937_v1, 1  ;;  %vm338_vm2 = vcmp.lt.s32.totalorder %v1937_v1, 9  ;;  %vm373_vm3 = vcmp.lt.s32.totalorder %v1937_v1, 6  ;;  %397 = vperm.xlu2 %1666, %v393_v21  }
  0x1e   : > { %v350_v4 = vsel %vm347_vm0, %v317_v3, 0.0  ;;  %v1646_v5 = vpack.i.bf16 %v317_v3, %v316_v2  ;;  %v349_v6 = vsel %vm347_vm0, %v316_v2, 0.0  ;;  %vm1952_vm4 = vmand %vm337_vm1, %vm338_vm2  ;;  %vm324_vm5 = vcmp.ge.s32.totalorder %v1937_v1, 2  ;;  %v1412_v42 = vld [vmem:[%s2286_s1] sm:$0xff]  ;;  %s1980_s21 = sand.u32 1, %s1825_s28   ;;  %s1753_s20 = sshra.s32 %s1130_s18, 4  ;;  %s1754_s20 = int_to_ptr.hbm [resolvable:$true] %s1753_s20 }
  0x1f   : > { %v1458_v7 = vpack.c.bf16 %v350_v4, %v349_v6  ;;  %vm325_vm6 = vcmp.lt.s32.totalorder %v1937_v1, 10  ;;  %vm360_vm7 = vcmp.lt.s32.totalorder %v1937_v1, 7  ;;  %s1110_s19 = scalar_lea.sflag [#allocation4], %s1980_s21  ;;  %s1759_s0 = scalar_lea.hbm %s2275_s7, 48 }
  0x20   : > { %1647 = vrot.lane.b32.xlu0 %v1646_v5, %s1835_s22  ;;  %1657 = vrot.lane.b32.xlu1 %v1646_v5, %s1836_s23  ;;  %vm326_vm8 = vmand %vm324_vm5, %vm325_vm6  ;;  %s1593_s22 = smul.u32 24, %s1980_s21  ;;  %p1760_p0 = scmp.lt.s32.totalorder %s1754_s20, %s2275_s7 }
  0x21   : > { %1576 = vst [vmem:[#allocation2 + $0x20] sm:$0xff] %v1458_v7  }
  0x25   : > { %402 = vperm.xlu2 %1666, %v394_v36  }
  0x28   : > { %1652 = vrot.lane.b32.xlu0 %v1646_v5, %s1837_s24  ;;  %1662 = vrot.lane.b32.xlu1 %v1646_v5, %s1838_s25  ;;  %v1415_v39 = vld [vmem:[#allocation2 + $0x20] sm:$0xff]  ;;  %s1997_s25 = scalar_lea.vmem [#allocation3], %s1593_s22  ;;  %s1755_s22 = scalar_lea.hbm %s1754_s20, 24 }
  0x29   : > { %s1127_s17 = sshll.u32 %s1997_s25, 4  ;;  %p1756_p11 = scmp.ne.s32.totalorder %s1754_s20, %s1755_s22  ;;  %s1128_s17 = int_to_ptr.vmem [resolvable:$true] %s1127_s17 }
  0x2a   : > { %p1761_p1 = scmp.lt.s32.totalorder %s1759_s0, %s1755_s22 }
  0x2b   : > { %p1757_p12 = pnand %p1756_p11, %p1925_p5 }
  0x2c   : > { %p1762_p2 = por %p1761_p1, %p1760_p0 }
  0x2d   : > { %502 = vperm.xlu2 %1666, %v498_v38   ;;  %p1758_p13 = pneg %p1757_p12 }
  0x2f   : > { %p1763_p3 = pnand %p1762_p2, %p1758_p13 }
  0x77   : > { %v398_v43 = vpop.permute.xlu2 %397 }
  0x7f   : > { %v403_v47 = vpop.permute.xlu2 %402 }
  0x92   : > { %v1648_v8 = vpop.permute.xlu0 %1647  ;;  %v1658_v12 = vpop.permute.xlu1 %1657 }
  0x93   : > { %v1650_v9 = vunpack.i.h.bf16 %v1648_v8  ;;  %v1649_v10 = vunpack.i.l.bf16 %v1648_v8  ;;  %v1660_v13 = vunpack.i.h.bf16 %v1658_v12  ;;  %v1659_v14 = vunpack.i.l.bf16 %v1658_v12 }
  0x95   : > { %v376_v15 = vsel %vm373_vm3, %v1650_v9, 0.0  ;;  %v375_v16 = vsel %vm373_vm3, %v1649_v10, 0.0  ;;  %v341_v18 = vsel %vm1952_vm4, %v1660_v13, 0.0  ;;  %v340_v19 = vsel %vm1952_vm4, %v1659_v14, 0.0  ;;  %v1418_v10 = vld [vmem:[%s2271_s3] sm:$0xff]  ;;  %v503_v13 = vpop.permute.xlu2 %502 }
  0x96   : > { %v1468_v17 = vpack.c.bf16 %v376_v15, %v375_v16  ;;  %v1453_v20 = vpack.c.bf16 %v341_v18, %v340_v19 }
  0x98   : > { %1578 = vst [vmem:[#allocation2 + $0x18] sm:$0xff] %v1468_v17  }
  0x99   : > { %1575 = vst [vmem:[#allocation2] sm:$0xff] %v1453_v20  }
  0x9a   : > { %v1653_v23 = vpop.permute.xlu0 %1652  ;;  %v1663_v26 = vpop.permute.xlu1 %1662 }
  0x9b   : > { %v1655_v24 = vunpack.i.h.bf16 %v1653_v23  ;;  %v1654_v25 = vunpack.i.l.bf16 %v1653_v23  ;;  %v1665_v27 = vunpack.i.h.bf16 %v1663_v26  ;;  %v1664_v28 = vunpack.i.l.bf16 %v1663_v26  ;;  %v1291_v26 = vld [vmem:[%s2272_s4 + $0x18] sm:$0xff] }
  0x9d   : > { %v363_v29 = vsel %vm360_vm7, %v1655_v24, 0.0  ;;  %v362_v30 = vsel %vm360_vm7, %v1654_v25, 0.0  ;;  %v328_v32 = vsel %vm326_vm8, %v1665_v27, 0.0  ;;  %v327_v33 = vsel %vm326_vm8, %v1664_v28, 0.0  ;;  %v1311_v27 = vld [vmem:[%s2272_s4 + $0x20] sm:$0xff] }
  0x9e   : > { %v1463_v31 = vpack.c.bf16 %v363_v29, %v362_v30  ;;  %v1448_v35 = vpack.c.bf16 %v328_v32, %v327_v33 }
  0x9f   : > { %v1417_v34 = vld [vmem:[#allocation2 + $0x18] sm:$0xff] }
  0xa0   : > { %1577 = vst [vmem:[#allocation2 + $0x10] sm:$0xff] %v1463_v31   ;;  %447 = vmatpush.bf16.msra.mxu0 %v1417_v34  ;;  %v1414_v40 = vld [vmem:[#allocation2] sm:$0xff]  ;;  %v1290_v34 = vld [vmem:[%s2272_s4 + $0x10] sm:$0xff] }
  0xa1   : > { %1449 = vst [vmem:[#allocation2 + $0x8] sm:$0xff] %v1448_v35  }
  0xa7   : > { %v1416_v37 = vld [vmem:[#allocation2 + $0x10] sm:$0xff] }
  0xa8   : > { %448 = vmatpush.bf16.msra.mxu0 %v1416_v37  ;;  %v1413_v41 = vld [vmem:[#allocation2 + $0x8] sm:$0xff] }
  0xac   : > { %449 = vmatpush.bf16.msra.mxu0 %v1415_v39 }
  0xb0   : > { %450 = vmatpush.bf16.msra.mxu0 %v1414_v40 }
  0xb4   : > { %451 = vmatpush.bf16.msra.mxu0 %v1413_v41 }
  0xb7   : > { %1270 = vmatmul.msk.bf16.vlgmr.msra.gmra.mxu0 %vm440_vm9, %v1412_v42 }
 0x134   : > { %v453_v44 = vpop.f32.mrf.mxu0 }
 0x135   : > { %v454_v45 = vadd.f32 %v453_v44, %v398_v43  ;;  %v1422_v44 = vld [vmem:[%s2271_s3 + $0x8] sm:$0xff] }
 0x137   : > { %v460_v46 = vmul.f32 0.1, %v454_v45  ;;  %vm458_vm10 = vcmp.ge.f32.partialorder %v454_v45, 0.0 }
 0x139   : > { %v1983_v50 = vsel %vm458_vm10, %v454_v45, %v460_v46 }
 0x13a   : > { %v474_v53 = vsel %vm347_vm0, %v1983_v50, 0.0 }
 0x13c   : > { %v455_v48 = vpop.f32.mrf.mxu0 }
 0x13d   : > { %v456_v49 = vadd.f32 %v455_v48, %v403_v47 }
 0x13f   : > { %vm459_vm11 = vcmp.ge.f32.partialorder %v456_v49, 0.0  ;;  %v461_v51 = vmul.f32 0.1, %v456_v49 }
 0x141   : > { %v1985_v52 = vsel %vm459_vm11, %v456_v49, %v461_v51 }
 0x142   : > { %v475_v54 = vsel %vm347_vm0, %v1985_v52, 0.0  ;;  %v1672_v55 = vpack.i.bf16 %v1985_v52, %v1983_v50 }
 0x143   : > { %v1478_v56 = vpack.c.bf16 %v475_v54, %v474_v53 }
 0x144   : > { %1673 = vrot.lane.b32.xlu1 %v1672_v55, %s1836_s23  ;;  %1668 = vrot.lane.b32.xlu0 %v1672_v55, %s1837_s24 }
 0x145   : > { %1579 = vst [vmem:[%s1997_s25 + $0x8] sm:$0xff] %v1478_v56  }
 0x14c   : > { %507 = vperm.xlu0 %1677, %v499_v57   ;;  %v1420_v8 = vld [vmem:[%s1997_s25 + $0x8] sm:$0xff] }
 0x1b6   : > { %v1674_v58 = vpop.permute.xlu1 %1673  ;;  %v1669_v59 = vpop.permute.xlu0 %1668 }
 0x1b7   : > { %v1676_v60 = vunpack.i.h.bf16 %v1674_v58  ;;  %v1675_v61 = vunpack.i.l.bf16 %v1674_v58  ;;  %v1671_v62 = vunpack.i.h.bf16 %v1669_v59  ;;  %v1670_v63 = vunpack.i.l.bf16 %v1669_v59 }
 0x1b9   : > { %v469_v0 = vsel %vm1952_vm4, %v1676_v60, 0.0  ;;  %v468_v2 = vsel %vm1952_vm4, %v1675_v61, 0.0  ;;  %v485_v3 = vsel %vm360_vm7, %v1671_v62, 0.0  ;;  %v484_v4 = vsel %vm360_vm7, %v1670_v63, 0.0 }
 0x1ba   : > { %v1473_v5 = vpack.c.bf16 %v469_v0, %v468_v2  ;;  %v1483_v6 = vpack.c.bf16 %v485_v3, %v484_v4 }
 0x1bc   : > { %1474 = vst [vmem:[%s1997_s25] sm:$0xff] %v1473_v5  }
 0x1bd   : > { %1580 = vst [vmem:[%s1997_s25 + $0x10] sm:$0xff] %v1483_v6  }
 0x1be   : > { %v508_v15 = vpop.permute.xlu0 %507 }
 0x1c3   : > { %v1419_v9 = vld [vmem:[%s1997_s25] sm:$0xff] }
 0x1c4   : > { %v1421_v7 = vld [vmem:[%s1997_s25 + $0x10] sm:$0xff] }
 0x1c5   : > { %542 = vmatpush.bf16.msra.mxu1 %v1421_v7 }
 0x1c9   : > { %543 = vmatpush.bf16.msra.mxu1 %v1420_v8 }
 0x1cd   : > { %544 = vmatpush.bf16.msra.mxu1 %v1419_v9 }
 0x1d0   : > { %1287 = vmatmul.msk.bf16.vlgmr.msra.gmra.mxu1 %vm533_vm12, %v1418_v10 }
 0x24d   : > { %v546_v12 = vpop.f32.mrf.mxu1 }
 0x24e   : > { %v547_v14 = vadd.f32 %v546_v12, %v503_v13 }
 0x250   : > { %v553_v16 = vmul.f32 0.1, %v547_v14  ;;  %vm551_vm13 = vcmp.ge.f32.partialorder %v547_v14, 0.0 }
 0x252   : > { %v555_v19 = vsel %vm551_vm13, %v547_v14, %v553_v16  ;;  %v1426_v16 = vld [vmem:[%s2271_s3 + $0x10] sm:$0xff] }
 0x253   : > { %v567_v22 = vsel %vm347_vm0, %v555_v19, 0.0 }
 0x255   : > { %v548_v17 = vpop.f32.mrf.mxu1 }
 0x256   : > { %v549_v18 = vadd.f32 %v548_v17, %v508_v15 }
 0x258   : > { %vm552_vm14 = vcmp.ge.f32.partialorder %v549_v18, 0.0  ;;  %v554_v20 = vmul.f32 0.1, %v549_v18 }
 0x25a   : > { %v556_v21 = vsel %vm552_vm14, %v549_v18, %v554_v20 }
 0x25b   : > { %v568_v23 = vsel %vm347_vm0, %v556_v21, 0.0  ;;  %v1683_v24 = vpack.i.bf16 %v556_v21, %v555_v19 }
 0x25c   : > { %v1493_v25 = vpack.c.bf16 %v568_v23, %v567_v22 }
 0x25d   : > { %1684 = vrot.lane.b32.xlu2 %v1683_v24, %s1836_s23  ;;  %1679 = vrot.lane.b32.xlu1 %v1683_v24, %s1837_s24 }
 0x25e   : > { %1581 = vst [vmem:[%s1997_s25 + $0x8] sm:$0xff] %v1493_v25  }
 0x265   : > { %602 = vperm.xlu2 %1666, %v1291_v26   ;;  %597 = vperm.xlu1 %1688, %v1290_v34   ;;  %v1424_v42 = vld [vmem:[%s1997_s25 + $0x8] sm:$0xff] }
 0x26d   : > { %693 = vperm.xlu2 %1666, %v1311_v27  }
 0x2b7   : > { %v1685_v28 = vpop.permute.xlu2 %1684 }
 0x2b8   : > { %v1687_v29 = vunpack.i.h.bf16 %v1685_v28  ;;  %v1686_v30 = vunpack.i.l.bf16 %v1685_v28 }
 0x2ba   : > { %v562_v31 = vsel %vm1952_vm4, %v1687_v29, 0.0  ;;  %v561_v32 = vsel %vm1952_vm4, %v1686_v30, 0.0 }
 0x2bb   : > { %v1488_v33 = vpack.c.bf16 %v562_v31, %v561_v32  ;;  %v1333_v31 = vld [vmem:[%s2272_s4 + $0x38] sm:$0xff]  ;;  %v1353_v32 = vld [vmem:[%s2272_s4 + $0x40] sm:$0xff] }
 0x2bd   : > { %1489 = vst [vmem:[%s1997_s25] sm:$0xff] %v1488_v33  }
 0x2bf   : > { %v603_v49 = vpop.permute.xlu2 %602 }
 0x2c4   : > { %v1423_v43 = vld [vmem:[%s1997_s25] sm:$0xff] }
 0x2c7   : > { %v694_v18 = vpop.permute.xlu2 %693 }
 0x2cf   : > { %v1680_v35 = vpop.permute.xlu1 %1679 }
 0x2d0   : > { %v1682_v36 = vunpack.i.h.bf16 %v1680_v35  ;;  %v1681_v37 = vunpack.i.l.bf16 %v1680_v35 }
 0x2d2   : > { %v578_v38 = vsel %vm360_vm7, %v1682_v36, 0.0  ;;  %v577_v39 = vsel %vm360_vm7, %v1681_v37, 0.0 }
 0x2d3   : > { %v1498_v40 = vpack.c.bf16 %v578_v38, %v577_v39 }
 0x2d5   : > { %1582 = vst [vmem:[%s1997_s25 + $0x10] sm:$0xff] %v1498_v40  }
 0x2d7   : > { %v598_v45 = vpop.permute.xlu1 %597 }
 0x2dc   : > { %v1425_v41 = vld [vmem:[%s1997_s25 + $0x10] sm:$0xff] }
 0x2dd   : > { %636 = vmatpush.bf16.msra.mxu2 %v1425_v41 }
 0x2e1   : > { %637 = vmatpush.bf16.msra.mxu2 %v1424_v42 }
 0x2e5   : > { %638 = vmatpush.bf16.msra.mxu2 %v1423_v43 }
 0x2e8   : > { %1308 = vmatmul.msk.bf16.vlgmr.msra.gmra.mxu2 %vm533_vm12, %v1422_v44 }
 0x36b   : > { %v640_v46 = vpop.f32.mrf.mxu2 }
 0x36c   : > { %v641_v47 = vadd.f32 %v640_v46, %v598_v45 }
 0x36e   : > { %v647_v48 = vmul.f32 0.1, %v641_v47  ;;  %vm645_vm15 = vcmp.ge.f32.partialorder %v641_v47, 0.0 }
 0x370   : > { %v649_v53 = vsel %vm645_vm15, %v641_v47, %v647_v48  ;;  %v1430_v48 = vld [vmem:[%s2271_s3 + $0x18] sm:$0xff] }
 0x371   : > { %v2054_v56 = vadd.f32 %v649_v53, %v1983_v50  ;;  %v1312_v50 = vld [vmem:[%s2272_s4 + $0x28] sm:$0xff] }
 0x373   : > { %v642_v51 = vpop.f32.mrf.mxu2  ;;  %v663_v59 = vsel %vm347_vm0, %v2054_v56, 0.0 }
 0x374   : > { %v643_v54 = vadd.f32 %v642_v51, %v603_v49 }
 0x376   : > { %vm646_vm1 = vcmp.ge.f32.partialorder %v643_v54, 0.0  ;;  %v648_v55 = vmul.f32 0.1, %v643_v54 }
 0x378   : > { %v650_v57 = vsel %vm646_vm1, %v643_v54, %v648_v55 }
 0x379   : > { %v2057_v58 = vadd.f32 %v650_v57, %v1985_v52  ;;  %v1332_v52 = vld [vmem:[%s2272_s4 + $0x30] sm:$0xff] }
 0x37b   : > { %v664_v60 = vsel %vm347_vm0, %v2057_v58, 0.0  ;;  %v1694_v61 = vpack.i.bf16 %v2057_v58, %v2054_v56 }
 0x37c   : > { %v1508_v62 = vpack.c.bf16 %v664_v60, %v663_v59 }
 0x37d   : > { %1695 = vrot.lane.b32.xlu1 %v1694_v61, %s1836_s23  ;;  %1690 = vrot.lane.b32.xlu0 %v1694_v61, %s1837_s24 }
 0x37e   : > { %1583 = vst [vmem:[%s1997_s25 + $0x8] sm:$0xff] %v1508_v62  }
 0x385   : > { %698 = vperm.xlu0 %1677, %v1312_v50   ;;  %v1428_v14 = vld [vmem:[%s1997_s25 + $0x8] sm:$0xff] }
 0x38d   : > { %787 = vperm.xlu0 %1677, %v1332_v52  }
 0x3ef   : > { %v1696_v63 = vpop.permute.xlu1 %1695  ;;  %v1691_v0 = vpop.permute.xlu0 %1690 }
 0x3f0   : > { %v1698_v2 = vunpack.i.h.bf16 %v1696_v63  ;;  %v1697_v3 = vunpack.i.l.bf16 %v1696_v63  ;;  %v1693_v4 = vunpack.i.h.bf16 %v1691_v0  ;;  %v1692_v5 = vunpack.i.l.bf16 %v1691_v0 }
 0x3f2   : > { %v658_v6 = vsel %vm1952_vm4, %v1698_v2, 0.0  ;;  %v657_v7 = vsel %vm1952_vm4, %v1697_v3, 0.0  ;;  %v674_v8 = vsel %vm360_vm7, %v1693_v4, 0.0  ;;  %v673_v9 = vsel %vm360_vm7, %v1692_v5, 0.0 }
 0x3f3   : > { %v1503_v10 = vpack.c.bf16 %v658_v6, %v657_v7  ;;  %v1513_v12 = vpack.c.bf16 %v674_v8, %v673_v9 }
 0x3f5   : > { %1504 = vst [vmem:[%s1997_s25] sm:$0xff] %v1503_v10  }
 0x3f6   : > { %1584 = vst [vmem:[%s1997_s25 + $0x10] sm:$0xff] %v1513_v12  }
 0x3f7   : > { %v699_v21 = vpop.permute.xlu0 %698 }
 0x3fc   : > { %v1427_v15 = vld [vmem:[%s1997_s25] sm:$0xff] }
 0x3fd   : > { %v1429_v13 = vld [vmem:[%s1997_s25 + $0x10] sm:$0xff] }
 0x3fe   : > { %732 = vmatpush.bf16.msra.mxu3 %v1429_v13 }
 0x3ff   : > { %v788_v49 = vpop.permute.xlu0 %787 }
 0x402   : > { %733 = vmatpush.bf16.msra.mxu3 %v1428_v14 }
 0x406   : > { %734 = vmatpush.bf16.msra.mxu3 %v1427_v15 }
 0x409   : > { %1329 = vmatmul.msk.bf16.vlgmr.msra.gmra.mxu3 %vm533_vm12, %v1426_v16 }
 0x48c   : > { %v736_v17 = vpop.f32.mrf.mxu3 }
 0x48d   : > { %v737_v19 = vadd.f32 %v736_v17, %v694_v18 }
 0x48f   : > { %v743_v20 = vmul.f32 0.1, %v737_v19  ;;  %vm741_vm2 = vcmp.ge.f32.partialorder %v737_v19, 0.0 }
 0x491   : > { %v745_v24 = vsel %vm741_vm2, %v737_v19, %v743_v20  ;;  %v1434_v20 = vld [vmem:[%s2271_s3 + $0x20] sm:$0xff] }
 0x492   : > { %v757_v27 = vsel %vm347_vm0, %v745_v24, 0.0 }
 0x494   : > { %v738_v22 = vpop.f32.mrf.mxu3 }
 0x495   : > { %v739_v23 = vadd.f32 %v738_v22, %v699_v21 }
 0x497   : > { %vm742_vm3 = vcmp.ge.f32.partialorder %v739_v23, 0.0  ;;  %v744_v25 = vmul.f32 0.1, %v739_v23 }
 0x499   : > { %v746_v26 = vsel %vm742_vm3, %v739_v23, %v744_v25 }
 0x49a   : > { %v758_v28 = vsel %vm347_vm0, %v746_v26, 0.0  ;;  %v1704_v29 = vpack.i.bf16 %v746_v26, %v745_v24 }
 0x49b   : > { %v1523_v30 = vpack.c.bf16 %v758_v28, %v757_v27 }
 0x49c   : > { %1705 = vrot.lane.b32.xlu2 %v1704_v29, %s1836_s23  ;;  %1700 = vrot.lane.b32.xlu1 %v1704_v29, %s1837_s24 }
 0x49d   : > { %1585 = vst [vmem:[%s1997_s25 + $0x8] sm:$0xff] %v1523_v30  }
 0x4a4   : > { %792 = vperm.xlu1 %1688, %v1333_v31   ;;  %v1432_v46 = vld [vmem:[%s1997_s25 + $0x8] sm:$0xff] }
 0x4ac   : > { %883 = vperm.xlu1 %1688, %v1353_v32  }
 0x4f6   : > { %v1706_v33 = vpop.permute.xlu2 %1705 }
 0x4f7   : > { %v1708_v34 = vunpack.i.h.bf16 %v1706_v33  ;;  %v1707_v35 = vunpack.i.l.bf16 %v1706_v33 }
 0x4f9   : > { %v752_v36 = vsel %vm1952_vm4, %v1708_v34, 0.0  ;;  %v751_v37 = vsel %vm1952_vm4, %v1707_v35, 0.0  ;;  %v1375_v35 = vld [vmem:[%s2272_s4 + $0x58] sm:$0xff] }
 0x4fa   : > { %v1518_v38 = vpack.c.bf16 %v752_v36, %v751_v37  ;;  %v1066_v36 = vld [vmem:[%s2274_s6] sm:$0xff] }
 0x4fc   : > { %1519 = vst [vmem:[%s1997_s25] sm:$0xff] %v1518_v38  }
 0x503   : > { %v1431_v47 = vld [vmem:[%s1997_s25] sm:$0xff] }
 0x50e   : > { %v1701_v39 = vpop.permute.xlu1 %1700 }
 0x50f   : > { %v1703_v40 = vunpack.i.h.bf16 %v1701_v39  ;;  %v1702_v41 = vunpack.i.l.bf16 %v1701_v39 }
 0x511   : > { %v768_v42 = vsel %vm360_vm7, %v1703_v40, 0.0  ;;  %v767_v43 = vsel %vm360_vm7, %v1702_v41, 0.0 }
 0x512   : > { %v1528_v44 = vpack.c.bf16 %v768_v42, %v767_v43 }
 0x514   : > { %1586 = vst [vmem:[%s1997_s25 + $0x10] sm:$0xff] %v1528_v44  }
 0x516   : > { %v793_v55 = vpop.permute.xlu1 %792 }
 0x51b   : > { %v1433_v45 = vld [vmem:[%s1997_s25 + $0x10] sm:$0xff] }
 0x51c   : > { %826 = vmatpush.bf16.msrb.mxu1 %v1433_v45 }
 0x51e   : > { %v884_v22 = vpop.permute.xlu1 %883 }
 0x520   : > { %827 = vmatpush.bf16.msrb.mxu1 %v1432_v46 }
 0x524   : > { %828 = vmatpush.bf16.msrb.mxu1 %v1431_v47 }
 0x527   : > { %1350 = vmatmul.msk.bf16.vlgmr.msrb.gmra.mxu1 %vm533_vm12, %v1430_v48 }
 0x5a4   : > { %v830_v51 = vpop.f32.mrf.mxu1 }
 0x5a5   : > { %v831_v53 = vadd.f32 %v830_v51, %v788_v49 }
 0x5a7   : > { %v837_v54 = vmul.f32 0.1, %v831_v53  ;;  %vm835_vm5 = vcmp.ge.f32.partialorder %v831_v53, 0.0 }
 0x5a9   : > { %v839_v59 = vsel %vm835_vm5, %v831_v53, %v837_v54  ;;  %v1438_v54 = vld [vmem:[%s2271_s3 + $0x28] sm:$0xff] }
 0x5aa   : > { %v2124_v62 = vadd.f32 %v839_v59, %v2054_v56  ;;  %v1354_v56 = vld [vmem:[%s2272_s4 + $0x48] sm:$0xff] }
 0x5ac   : > { %v832_v57 = vpop.f32.mrf.mxu1  ;;  %v853_v63 = vsel %vm347_vm0, %v2124_v62, 0.0 }
 0x5ad   : > { %v833_v60 = vadd.f32 %v832_v57, %v793_v55 }
 0x5af   : > { %vm836_vm6 = vcmp.ge.f32.partialorder %v833_v60, 0.0  ;;  %v838_v61 = vmul.f32 0.1, %v833_v60 }
 0x5b1   : > { %v840_v50 = vsel %vm836_vm6, %v833_v60, %v838_v61 }
 0x5b2   : > { %v2127_v52 = vadd.f32 %v840_v50, %v2057_v58  ;;  %v1374_v58 = vld [vmem:[%s2272_s4 + $0x50] sm:$0xff] }
 0x5b4   : > { %v854_v0 = vsel %vm347_vm0, %v2127_v52, 0.0  ;;  %v1714_v2 = vpack.i.bf16 %v2127_v52, %v2124_v62 }
 0x5b5   : > { %v1538_v3 = vpack.c.bf16 %v854_v0, %v853_v63 }
 0x5b6   : > { %1715 = vrot.lane.b32.xlu0 %v1714_v2, %s1836_s23  ;;  %1710 = vrot.lane.b32.xlu2 %v1714_v2, %s1837_s24 }
 0x5b7   : > { %1587 = vst [vmem:[%s1997_s25 + $0x8] sm:$0xff] %v1538_v3  }
 0x5be   : > { %888 = vperm.xlu2 %1666, %v1354_v56   ;;  %v1436_v12 = vld [vmem:[%s1997_s25 + $0x8] sm:$0xff] }
 0x5c6   : > { %977 = vperm.xlu2 %1666, %v1374_v58  }
 0x610   : > { %v1711_v4 = vpop.permute.xlu2 %1710 }
 0x611   : > { %v1713_v5 = vunpack.i.h.bf16 %v1711_v4  ;;  %v1712_v6 = vunpack.i.l.bf16 %v1711_v4 }
 0x613   : > { %v864_v7 = vsel %vm360_vm7, %v1713_v5, 0.0  ;;  %v863_v8 = vsel %vm360_vm7, %v1712_v6, 0.0 }
 0x614   : > { %v1543_v9 = vpack.c.bf16 %v864_v7, %v863_v8 }
 0x616   : > { %1588 = vst [vmem:[%s1997_s25 + $0x10] sm:$0xff] %v1543_v9  }
 0x618   : > { %v889_v25 = vpop.permute.xlu2 %888 }
 0x61d   : > { %v1437_v10 = vld [vmem:[%s1997_s25 + $0x10] sm:$0xff] }
 0x61e   : > { %922 = vmatpush.bf16.msrb.mxu2 %v1437_v10 }
 0x620   : > { %v978_v55 = vpop.permute.xlu2 %977 }
 0x622   : > { %923 = vmatpush.bf16.msrb.mxu2 %v1436_v12 }
 0x628   : > { %v1716_v13 = vpop.permute.xlu0 %1715 }
 0x629   : > { %v1718_v14 = vunpack.i.h.bf16 %v1716_v13  ;;  %v1717_v15 = vunpack.i.l.bf16 %v1716_v13 }
 0x62b   : > { %v848_v16 = vsel %vm1952_vm4, %v1718_v14, 0.0  ;;  %v847_v17 = vsel %vm1952_vm4, %v1717_v15, 0.0 }
 0x62c   : > { %v1533_v18 = vpack.c.bf16 %v848_v16, %v847_v17 }
 0x62e   : > { %1534 = vst [vmem:[%s1997_s25] sm:$0xff] %v1533_v18  }
 0x635   : > { %v1435_v19 = vld [vmem:[%s1997_s25] sm:$0xff] }
 0x636   : > { %924 = vmatpush.bf16.msrb.mxu2 %v1435_v19 }
 0x639   : > { %1371 = vmatmul.msk.bf16.vlgmr.msrb.gmra.mxu2 %vm533_vm12, %v1434_v20 }
 0x6bc   : > { %v926_v21 = vpop.f32.mrf.mxu2 }
 0x6bd   : > { %v927_v23 = vadd.f32 %v926_v21, %v884_v22  ;;  %v1059_v21 = vld [vmem:[%s2273_s5] sm:$0xf] }
 0x6bf   : > { %v933_v24 = vmul.f32 0.1, %v927_v23  ;;  %vm931_vm8 = vcmp.ge.f32.partialorder %v927_v23, 0.0 }
 0x6c1   : > { %v935_v28 = vsel %vm931_vm8, %v927_v23, %v933_v24 }
 0x6c2   : > { %v947_v31 = vsel %vm347_vm0, %v935_v28, 0.0 }
 0x6c4   : > { %v928_v26 = vpop.f32.mrf.mxu2 }
 0x6c5   : > { %v929_v27 = vadd.f32 %v928_v26, %v889_v25 }
 0x6c7   : > { %vm932_vm9 = vcmp.ge.f32.partialorder %v929_v27, 0.0  ;;  %v934_v29 = vmul.f32 0.1, %v929_v27 }
 0x6c9   : > { %v936_v30 = vsel %vm932_vm9, %v929_v27, %v934_v29 }
 0x6ca   : > { %v948_v32 = vsel %vm347_vm0, %v936_v30, 0.0  ;;  %v1724_v33 = vpack.i.bf16 %v936_v30, %v935_v28 }
 0x6cb   : > { %v1553_v34 = vpack.c.bf16 %v948_v32, %v947_v31 }
 0x6cc   : > { %1725 = vrot.lane.b32.xlu1 %v1724_v33, %s1836_s23  ;;  %1720 = vrot.lane.b32.xlu0 %v1724_v33, %s1837_s24 }
 0x6cd   : > { %1589 = vst [vmem:[%s1997_s25 + $0x8] sm:$0xff] %v1553_v34  }
 0x6d4   : > { %982 = vperm.xlu0 %1677, %v1375_v35   ;;  %v1440_v51 = vld [vmem:[%s1997_s25 + $0x8] sm:$0xff] }
 0x6dc   : > { %1069 = vperm.xlu0 %1677, %v1066_v36  }
 0x73e   : > { %v1726_v37 = vpop.permute.xlu1 %1725  ;;  %v1721_v38 = vpop.permute.xlu0 %1720 }
 0x73f   : > { %v1728_v39 = vunpack.i.h.bf16 %v1726_v37  ;;  %v1727_v40 = vunpack.i.l.bf16 %v1726_v37  ;;  %v1723_v41 = vunpack.i.h.bf16 %v1721_v38  ;;  %v1722_v42 = vunpack.i.l.bf16 %v1721_v38 }
 0x741   : > { %v942_v43 = vsel %vm1952_vm4, %v1728_v39, 0.0  ;;  %v941_v44 = vsel %vm1952_vm4, %v1727_v40, 0.0  ;;  %v958_v45 = vsel %vm360_vm7, %v1723_v41, 0.0  ;;  %v957_v46 = vsel %vm360_vm7, %v1722_v42, 0.0 }
 0x742   : > { %v1548_v47 = vpack.c.bf16 %v942_v43, %v941_v44  ;;  %v1558_v48 = vpack.c.bf16 %v958_v45, %v957_v46 }
 0x744   : > { %1549 = vst [vmem:[%s1997_s25] sm:$0xff] %v1548_v47  }
 0x745   : > { %1590 = vst [vmem:[%s1997_s25 + $0x10] sm:$0xff] %v1558_v48  }
 0x746   : > { %v983_v61 = vpop.permute.xlu0 %982 }
 0x74b   : > { %v1439_v53 = vld [vmem:[%s1997_s25] sm:$0xff] }
 0x74c   : > { %v1441_v49 = vld [vmem:[%s1997_s25 + $0x10] sm:$0xff] }
 0x74d   : > { %1016 = vmatpush.bf16.msrb.mxu3 %v1441_v49 }
 0x751   : > { %1017 = vmatpush.bf16.msrb.mxu3 %v1440_v51 }
 0x755   : > { %1018 = vmatpush.bf16.msrb.mxu3 %v1439_v53 }
 0x758   : > { %1392 = vmatmul.msk.bf16.vlgmr.msrb.gmra.mxu3 %vm533_vm12, %v1438_v54 }
 0x7db   : > { %v1020_v57 = vpop.f32.mrf.mxu3 }
 0x7dc   : > { %v1021_v59 = vadd.f32 %v1020_v57, %v978_v55 }
 0x7de   : > { %v1027_v60 = vmul.f32 0.1, %v1021_v59  ;;  %vm1025_vm10 = vcmp.ge.f32.partialorder %v1021_v59, 0.0 }
 0x7e0   : > { %v1029_v63 = vsel %vm1025_vm10, %v1021_v59, %v1027_v60 }
 0x7e1   : > { %v1031_v3 = vadd.f32 %v1029_v63, %v2124_v62 }
 0x7e3   : > { %v1022_v50 = vpop.f32.mrf.mxu3  ;;  %v1043_v4 = vsel %vm347_vm0, %v1031_v3, 0.0 }
 0x7e4   : > { %v1023_v0 = vadd.f32 %v1022_v50, %v983_v61 }
 0x7e6   : > { %vm1026_vm11 = vcmp.ge.f32.partialorder %v1023_v0, 0.0  ;;  %v1028_v2 = vmul.f32 0.1, %v1023_v0 }
 0x7e8   : > { %v1030_v56 = vsel %vm1026_vm11, %v1023_v0, %v1028_v2 }
 0x7e9   : > { %v1032_v58 = vadd.f32 %v1030_v56, %v2127_v52 }
 0x7eb   : > { %v1044_v5 = vsel %vm347_vm0, %v1032_v58, 0.0  ;;  %v1734_v6 = vpack.i.bf16 %v1032_v58, %v1031_v3 }
 0x7ec   : > { %v1568_v7 = vpack.c.bf16 %v1044_v5, %v1043_v4 }
 0x7ed   : > { %1735 = vrot.lane.b32.xlu2 %v1734_v6, %s1836_s23  ;;  %1730 = vrot.lane.b32.xlu1 %v1734_v6, %s1837_s24 }
 0x7ee   : > { %1591 = vst [vmem:[%s1997_s25 + $0x8] sm:$0xff] %v1568_v7  }
 0x7f5   : > { %v1443_v11 = vld [vmem:[%s1997_s25 + $0x8] sm:$0xff] }
 0x847   : > { %v1736_v62 = vpop.permute.xlu2 %1735 }
 0x848   : > { %v1738_v8 = vunpack.i.h.bf16 %v1736_v62  ;;  %v1737_v9 = vunpack.i.l.bf16 %v1736_v62 }
 0x84a   : > { %v1038_v52 = vsel %vm1952_vm4, %v1738_v8, 0.0  ;;  %v1037_v10 = vsel %vm1952_vm4, %v1737_v9, 0.0 }
 0x84b   : > { %v1563_v12 = vpack.c.bf16 %v1038_v52, %v1037_v10 }
 0x84d   : > { %1564 = vst [vmem:[%s1997_s25] sm:$0xff] %v1563_v12  }
 0x854   : > { %v1442_v20 = vld [vmem:[%s1997_s25] sm:$0xff] }
 0x85f   : > { %v1731_v13 = vpop.permute.xlu1 %1730 }
 0x860   : > { %v1733_v14 = vunpack.i.h.bf16 %v1731_v13  ;;  %v1732_v15 = vunpack.i.l.bf16 %v1731_v13 }
 0x862   : > { %v1054_v16 = vsel %vm360_vm7, %v1733_v14, 0.0  ;;  %v1053_v17 = vsel %vm360_vm7, %v1732_v15, 0.0 }
 0x863   : > { %v1573_v18 = vpack.c.bf16 %v1054_v16, %v1053_v17 }
 0x865   : > { %1592 = vst [vmem:[%s1997_s25 + $0x10] sm:$0xff] %v1573_v18  }
 0x86c   : > { %v1444_v19 = vld [vmem:[%s1997_s25 + $0x10] sm:$0xff] }
 0x86d   : > { %1098 = vmatpush.bf16.msrb.mxu0 %v1444_v19 }
 0x871   : > { %1099 = vmatpush.bf16.msrb.mxu0 %v1443_v11 }
 0x875   : > { %1100 = vmatpush.bf16.msrb.mxu0 %v1442_v20 }
 0x878   : > { %1405 = vmatmul.msk.bf16.vlgmr.msrb.gmra.mxu0 %vm533_vm12, %v1059_v21 }
 0x879   : > { %1766 = shalt.err (!%p1763_p3)
}
 0x87a   : > { %s1840_s25 = smov 64   ;;  %s1841_s26 = smov 4   ;;  %v1070_v1 = vpop.permute.xlu0 %1069  ;;  %vm1107_vm0 = vcmask 60416  }
 0x87b   : > { %1595 = dma.vmem_to_hbm [thread:$0]  (%p1925_p5), %s1128_s17, 384, %s1130_s18, %s1110_s19, %s1840_s25, %s1840_s25, %s1841_s26  }
 0x87c   : > { %s1243_s10 = sshll.u32 %s1980_s21, 2  ;;  %s1408_s12 = sshll.u32 %s1908_s9, 2 }
 0x87d   : > { %s1142_s24 = scalar_lea.hbm %s2276_s8, %s1408_s12  ;;  %s309_s0 = scalar_lea.vmem [#allocation5], %s1243_s10 }
 0x87e   : > { %s1144_s1 = sshll.u32 %s309_s0, 4  ;;  %s1146_s2 = sshll.u32 %s1142_s24, 4  ;;  %s1145_s1 = int_to_ptr.vmem [resolvable:$true] %s1144_s1  ;;  %s1147_s2 = int_to_ptr.hbm [resolvable:$true] %s1146_s2 }
 0x87f   : > { %s1115_s20 = scalar_lea.sflag [#allocation6], %s1980_s21  ;;  %s1781_s17 = sshra.s32 %s1147_s2, 4  ;;  %s1782_s17 = int_to_ptr.hbm [resolvable:$true] %s1781_s17 }
 0x880   : > { %s1783_s9 = scalar_lea.hbm %s1782_s17, 4  ;;  %s1787_s22 = scalar_lea.hbm %s2276_s8, 8 }
 0x881   : > { %p1784_p4 = scmp.ne.s32.totalorder %s1782_s17, %s1783_s9  ;;  %p1788_p9 = scmp.lt.s32.totalorder %s1782_s17, %s2276_s8 }
 0x882   : > { %p1789_p10 = scmp.lt.s32.totalorder %s1787_s22, %s1783_s9 }
 0x883   : > { %p1785_p7 = pnand %p1784_p4, %p1925_p5 }
 0x884   : > { %p1790_p11 = por %p1789_p10, %p1788_p9 }
 0x885   : > { %p1786_p8 = pneg %p1785_p7 }
 0x887   : > { %p1791_p12 = pnand %p1790_p11, %p1786_p8 }
 0x8f5   : > { %v1102_v22 = vpop.f32.mrf.mxu0 }
 0x8f6   : > { %v1103_v23 = vadd.f32 %v1102_v22, %v1070_v1 }
 0x8f8   : > { %v1106_v24 = vpack.c.bf16 %v1103_v23, %v1103_v23 }
 0x8fa   : > { %1108 = vst.msk [vmem:[%s309_s0] sm:$0xf] %vm1107_vm0, %v1106_v24 }
 0x8fb   : > { %1794 = shalt.err (!%p1791_p12)
}
 0x8fc   : > { %1596 = dma.vmem_to_hbm [thread:$0]  (%p1925_p5), %s1145_s1, 64, %s1147_s2, %s1115_s20  }
 0x8fd   : > { %v1104_v25 = vpop.f32.mrf.mxu0 }
 0x8fe PF: > { %p1606_p13 = scmp.ge.s32.totalorder %s1833_s30, 2  ;;  %s1158_s21 = sand.u32 1, %s1821_s27  }
 0x8ff   : > { %s1159_s10 = scalar_lea.sflag [#allocation4], %s1158_s21 }
 0x900   : > { %p1600_p0 = pnand %p1606_p13, %p1929_p6 }
 0x902   : > { %p1601_p1 = pneg %p1600_p0 }
 0x904   : > { %1812 = dma.done.wait (%p1601_p1), %s1159_s10, 384  }
 0x905   : > { %1814 = vsyncadd (%p1601_p1), %s1159_s10, 4294966912  ;;  %s1169_s12 = scalar_lea.sflag [#allocation6], %s1158_s21 }
 0x906   : > { %1816 = dma.done.wait (%p1601_p1), %s1169_s12, 64  }
 0x907   : > { %1818 = vsyncadd (%p1601_p1), %s1169_s12, 4294967232  ;;  %p22_p5 = scmp.ge.s32.totalorder %s1912_s11, 4   ;;  %s2287_s27 = smov %s1825_s28 }
 0x908   : > { %s2288_s28 = smov %s1829_s29  ;;  %s2289_s29 = smov %s1923_s14 }
 0x909   : > { %s2290_s30 = smov %s1912_s11  ;;  %24 = sbr.rel (!%p22_p5) target bundleno = 9 (0x9), region = 110 }
 0x90e   :  { %1175 = vsyncpa [#allocation4], 1 }
 0x90f   :  { %1177 = vsyncpa [#allocation4 + $0x1], 1 }
 0x910   :  { %1178 = vsyncpa [#allocation6], 1 }
 0x911   :  { %1180 = vsyncpa [#allocation6 + $0x1], 1 }

</bundles_post_ra>
